<compile_context>
chip_gen: v6e
topology: v6e:2x2x1
jax: 0.10.0
libtpu: 0.0.40
codegen_flags: <defaults>
</compile_context>

<pallas_src>
import functools

import jax
import jax.numpy as jnp
from jax import lax
from jax.experimental import pallas as pl
from jax.experimental.pallas import tpu as pltpu


def _up_conv_kernel(top_ref, x_ref, bot_ref, w_ref, scale_ref, shift_ref,
                    o_ref, xpad_ref, patch_ref):
    # top_ref:   (1, 1, W, Cin)    row t*TH-1 (clamped; zeroed in-kernel at t==0)
    # x_ref:     (1, TH, W, Cin)   core rows [t*TH, t*TH+TH)
    # bot_ref:   (1, 1, W, Cin)    row t*TH+TH (clamped; zeroed at t==last)
    # w_ref:     (9*Cin, COB)      phase-folded 3x3 taps (UNscaled), K = tap*Cin+cin
    # scale_ref: (1, COB)          f32 BN scale  gamma/sqrt(var+eps), tiled x4
    # shift_ref: (1, COB)          f32 shift     (bias-mean)*scale+beta, tiled x4
    # o_ref:     (1, TH, W, COB)   lane index = (2a+b)*Cout + c (phase-major)
    # xpad_ref:  (TH+2, W+2, Cin)  VMEM scratch: zero-padded input tile
    # patch_ref: (TH, W, 9*Cin)    VMEM scratch: im2col patch
    TH = x_ref.shape[1]
    W = x_ref.shape[2]
    Cin = x_ref.shape[3]
    COB = o_ref.shape[3]

    t = pl.program_id(2)
    n_t = pl.num_programs(2)
    dt = xpad_ref.dtype

    # ---- assemble zero-padded tile in VMEM (no HBM pad/gather pass) ----
    xpad_ref[:, 0:1, :] = jnp.zeros((TH + 2, 1, Cin), dt)          # left pad col
    xpad_ref[:, W + 1:W + 2, :] = jnp.zeros((TH + 2, 1, Cin), dt)  # right pad col
    xpad_ref[1:TH + 1, 1:W + 1, :] = x_ref[0]                      # core rows
    xpad_ref[0:1, 1:W + 1, :] = top_ref[0]                         # top halo row
    xpad_ref[TH + 1:TH + 2, 1:W + 1, :] = bot_ref[0]               # bottom halo row

    @pl.when(t == 0)
    def _():                                                       # image top border
        xpad_ref[0:1, 1:W + 1, :] = jnp.zeros((1, W, Cin), dt)

    @pl.when(t == n_t - 1)
    def _():                                                       # image bottom border
        xpad_ref[TH + 1:TH + 2, 1:W + 1, :] = jnp.zeros((1, W, Cin), dt)

    # ---- im2col (statically unrolled) then ONE MXU matmul ----
    for dy in range(3):
        for dx in range(3):
            tap = 3 * dy + dx
            patch_ref[:, :, tap * Cin:(tap + 1) * Cin] = (
                xpad_ref[dy:dy + TH, dx:dx + W, :])
    patch = patch_ref[...].reshape(TH * W, 9 * Cin)
    acc = jnp.dot(patch, w_ref[...], preferred_element_type=jnp.float32)

    # ---- BatchNorm (eval, folded scale+shift) + ReLU in f32 ----
    y = jnp.maximum(acc * scale_ref[...] + shift_ref[...], 0.0)
    o_ref[0] = y.reshape(TH, W, COB).astype(o_ref.dtype)


def _round_up(v, m):
    return ((v + m - 1) // m) * m


def _vreg_padded_bytes(shape, itemsize):
    """Approx VMEM footprint: last dim padded to 128 lanes, 2nd-last to 8 sublanes."""
    if len(shape) == 1:
        return _round_up(int(shape[0]), 128) * itemsize
    lead = 1
    for d in shape[:-2]:
        lead *= int(d)
    return lead * _round_up(int(shape[-2]), 8) * _round_up(int(shape[-1]), 128) * itemsize


def _vmem_capacity_bytes():
    try:
        get_info = getattr(pltpu, "get_tpu_info", None)
        if get_info is not None:
            cap = getattr(get_info(), "vmem_capacity_bytes", None)
            if cap:
                return int(cap)
    except Exception:
        pass
    return 64 * 1024 * 1024  # conservative default (v7x per-TensorCore VMEM)


def _choose_tiles(H, W, Cin, Cout, cbytes, budget):
    """Pick (row_tile TH, Cout block COB) against an explicit VMEM budget."""
    C4 = 4 * Cout
    # COB: largest divisor of 4*Cout whose (double-buffered) weight block stays
    # within ~half the budget.  Partial blocks must be 128-lane aligned.
    best = None
    for d in range(1, C4 + 1):
        if C4 % d:
            continue
        if d != C4 and d % 128:
            continue
        if 2 * _vreg_padded_bytes((9 * Cin, d), cbytes) <= max(budget // 2, 1):
            best = d
    cob = best if best is not None else (128 if C4 % 128 == 0 else C4)

    def step_bytes(th):
        b = 0
        b += 2 * _vreg_padded_bytes((1, th, W, Cin), cbytes)      # core input (x2 buf)
        b += 4 * _vreg_padded_bytes((1, 1, W, Cin), cbytes)       # halo rows  (x2 buf)
        b += 2 * _vreg_padded_bytes((9 * Cin, cob), cbytes)       # weight block
        b += 4 * _vreg_padded_bytes((1, cob), 4)                  # scale + shift
        b += _vreg_padded_bytes((th + 2, W + 2, Cin), cbytes)     # padded tile scratch
        b += _vreg_padded_bytes((th * W, 9 * Cin), cbytes)        # im2col patch
        b += _vreg_padded_bytes((th * W, cob), 4)                 # f32 accumulator
        b += 2 * _vreg_padded_bytes((1, th, W, cob), cbytes)      # output block (x2 buf)
        return b

    th = 1
    for d in range(1, H + 1):
        if H % d == 0 and step_bytes(d) <= budget:
            th = d
    return th, cob


def up_conv_forward(x_nchw, conv_w, conv_b, bn_gamma, bn_beta, bn_mean, bn_var,
                    eps=1e-5, compute_dtype=jnp.bfloat16, row_tile=None,
                    cout_tile=None):
    """x_nchw: (N, Cin, H, W) f32.  Returns (N, Cout, 2H, 2W) f32 (PyTorch layout)."""
    N, Cin, H, W = x_nchw.shape
    Cout = conv_w.shape[0]
    C4 = 4 * Cout

    # ---- BatchNorm (eval) folded to per-channel f32 scale/shift (epilogue) ----
    scale = bn_gamma / jnp.sqrt(bn_var + eps)                     # (Cout,)
    shift = (conv_b - bn_mean) * scale + bn_beta                  # (Cout,)
    scale4 = jnp.tile(scale, 4).reshape(1, C4).astype(jnp.float32)
    shift4 = jnp.tile(shift, 4).reshape(1, C4).astype(jnp.float32)

    # ---- sub-pixel (4-phase) decomposition of upsample+conv ----
    # Ry[a][dy, ky] = 1 iff original tap ky of output phase a reads padded-input
    # row offset dy (in {0,1,2}) at the ORIGINAL resolution.
    Ry = jnp.array([[[1., 0., 0.],
                     [0., 1., 1.],
                     [0., 0., 0.]],
                    [[0., 0., 0.],
                     [1., 1., 0.],
                     [0., 0., 1.]]], jnp.float32)
    # wbig[dy, dx, cin, a, b, cout]; K index = (3*dy+dx)*Cin + cin,
    # lane index = (2a+b)*Cout + cout.
    wbig = jnp.einsum('ayk,bxl,oikl->yxiabo', Ry, Ry, conv_w.astype(jnp.float32))
    wbig = wbig.reshape(9 * Cin, C4).astype(compute_dtype)

    # ---- tiling (generation-aware VMEM budget) ----
    cbytes = jnp.dtype(compute_dtype).itemsize
    vmem_cap = _vmem_capacity_bytes()
    budget = int(vmem_cap * 0.55)
    th_auto, cob_auto = _choose_tiles(H, W, Cin, Cout, cbytes, budget)
    if row_tile is None:
        TH = th_auto
    else:  # snap a user row_tile to the nearest divisor of H (never assert-fail)
        TH = max(d for d in range(1, min(int(row_tile), H) + 1) if H % d == 0)
    COB = cob_auto if cout_tile is None else int(cout_tile)
    assert C4 % COB == 0 and (COB == C4 or COB % 128 == 0), \
        f"cout_tile {COB} must divide {C4} and be 128-lane aligned"
    n_t = H // TH
    n_co = C4 // COB

    # ---- input: NCHW -> NHWC + cast, ONE fused XLA pass (no pad / gather) ----
    x = jnp.transpose(x_nchw, (0, 2, 3, 1)).astype(compute_dtype)   # (N, H, W, Cin)

    out = pl.pallas_call(
        _up_conv_kernel,
        out_shape=jax.ShapeDtypeStruct((N, H, W, C4), compute_dtype),
        grid_spec=pltpu.PrefetchScalarGridSpec(
            num_scalar_prefetch=0,
            grid=(N, n_co, n_t),
            in_specs=[
                # 1-row top halo (clamped at image border; zeroed in-kernel)
                pl.BlockSpec((1, 1, W, Cin),
                             lambda n, co, t: (n, jnp.maximum(t * TH - 1, 0), 0, 0)),
                # TH core rows
                pl.BlockSpec((1, TH, W, Cin), lambda n, co, t: (n, t, 0, 0)),
                # 1-row bottom halo (clamped; zeroed in-kernel)
                pl.BlockSpec((1, 1, W, Cin),
                             lambda n, co, t: (n, jnp.minimum(t * TH + TH, H - 1), 0, 0)),
                # weights / scale / shift: block index constant over t -> resident
                pl.BlockSpec((9 * Cin, COB), lambda n, co, t: (0, co)),
                pl.BlockSpec((1, COB), lambda n, co, t: (0, co)),
                pl.BlockSpec((1, COB), lambda n, co, t: (0, co)),
            ],
            out_specs=pl.BlockSpec((1, TH, W, COB),
                                   lambda n, co, t: (n, t, 0, co)),
            scratch_shapes=[
                pltpu.VMEM((TH + 2, W + 2, Cin), compute_dtype),     # padded tile
                pltpu.VMEM((TH, W, 9 * Cin), compute_dtype),         # im2col patch
            ],
        ),
        compiler_params=pltpu.CompilerParams(
            dimension_semantics=("parallel", "parallel", "arbitrary"),
            vmem_limit_bytes=min(int(vmem_cap * 0.75), 96 * 1024 * 1024)),
    )(x, x, x, wbig, scale4, shift4)

    # ---- phase interleave + NHWC->NCHW fused into ONE transpose (+ f32 cast) ----
    out = out.reshape(N, H, W, 2, 2, Cout)
    out = jnp.transpose(out, (0, 5, 1, 3, 2, 4))      # (N, Cout, H, 2, W, 2)
    return out.reshape(N, Cout, 2 * H, 2 * W).astype(jnp.float32)


def _reference(x_nchw, conv_w, conv_b, bn_gamma, bn_beta, bn_mean, bn_var,
               eps=1e-5):
    # pure-JAX reference (nearest upsample x2 + conv3x3 p1 + BN eval + ReLU)
    x = jnp.repeat(jnp.repeat(x_nchw, 2, axis=2), 2, axis=3)
    y = lax.conv_general_dilated(
        x, conv_w, window_strides=(1, 1), padding=((1, 1), (1, 1)),
        dimension_numbers=("NCHW", "OIHW", "NCHW"))
    y = y + conv_b[None, :, None, None]
    y = (y - bn_mean[None, :, None, None]) / jnp.sqrt(
        bn_var[None, :, None, None] + eps)
    y = y * bn_gamma[None, :, None, None] + bn_beta[None, :, None, None]
    return jnp.maximum(y, 0.0)


if __name__ == "__main__":
    key = jax.random.PRNGKey(0)
    k_x, k_w, k_b = jax.random.split(key, 3)

    N, Cin, Cout, H, W = 2, 4, 8, 16, 16

    x = jax.random.normal(k_x, (N, Cin, H, W), dtype=jnp.float32)

    # deterministic params (shapes per nn.Conv2d(in_ch, out_ch, 3) + BatchNorm2d)
    fan_in = Cin * 3 * 3
    bound = 1.0 / (fan_in ** 0.5)
    conv_w = jax.random.uniform(k_w, (Cout, Cin, 3, 3), jnp.float32,
                                minval=-bound, maxval=bound)
    conv_b = jax.random.uniform(k_b, (Cout,), jnp.float32,
                                minval=-bound, maxval=bound)
    bn_gamma = jnp.ones((Cout,), jnp.float32)
    bn_beta = jnp.zeros((Cout,), jnp.float32)
    bn_mean = jnp.zeros((Cout,), jnp.float32)
    bn_var = jnp.ones((Cout,), jnp.float32)

    ref = _reference(x, conv_w, conv_b, bn_gamma, bn_beta, bn_mean, bn_var)

    # f32 parity path; row_tile=8 exercises the halo / multi-row-tile grid.
    fwd_f32 = jax.jit(functools.partial(up_conv_forward,
                                        compute_dtype=jnp.float32, row_tile=8))
    out = jax.block_until_ready(
        fwd_f32(x, conv_w, conv_b, bn_gamma, bn_beta, bn_mean, bn_var))
    assert out.shape == (N, Cout, 2 * H, 2 * W)
    assert jnp.allclose(out, ref, atol=1e-4, rtol=1e-4)

    # default bf16 MXU path (f32 accumulation, f32 BN/ReLU epilogue), auto tiles.
    fwd_bf16 = jax.jit(functools.partial(up_conv_forward,
                                         compute_dtype=jnp.bfloat16))
    out_bf16 = jax.block_until_ready(
        fwd_bf16(x, conv_w, conv_b, bn_gamma, bn_beta, bn_mean, bn_var))
    assert out_bf16.shape == (N, Cout, 2 * H, 2 * W)
    assert jnp.allclose(out_bf16, ref, atol=5e-2, rtol=5e-2)

    print("KERNEL_OK")
</pallas_src>

<mosaic_0001>
module attributes {stable_mosaic.version = 11 : i64} {
  func.func @_up_conv_kernel(%arg0: i32, %arg1: i32, %arg2: i32, %arg3: memref<1x1x16x4xf32, #tpu.memory_space<vmem>>, %arg4: memref<1x8x16x4xf32, #tpu.memory_space<vmem>>, %arg5: memref<1x1x16x4xf32, #tpu.memory_space<vmem>>, %arg6: memref<36x32xf32, #tpu.memory_space<vmem>>, %arg7: memref<1x32xf32, #tpu.memory_space<vmem>>, %arg8: memref<1x32xf32, #tpu.memory_space<vmem>>, %arg9: memref<1x8x16x32xf32, #tpu.memory_space<vmem>>, %arg10: memref<10x18x4xf32, #tpu.memory_space<vmem>>, %arg11: memref<8x16x36xf32, #tpu.memory_space<vmem>>) attributes {dimension_semantics = [#tpu.dimension_semantics<parallel>, #tpu.dimension_semantics<parallel>, #tpu.dimension_semantics<arbitrary>], iteration_bounds = array<i64: 2, 1, 2>, scalar_prefetch = 0 : i64, scratch_operands = 2 : i64, tpu.core_type = #tpu.core_type<tc>, window_params = [{transform_indices = @transform_0, window_bounds = array<i64: 1, 1, 16, 4>}, {transform_indices = @transform_1, window_bounds = array<i64: 1, 8, 16, 4>}, {transform_indices = @transform_2, window_bounds = array<i64: 1, 1, 16, 4>}, {transform_indices = @transform_3, window_bounds = array<i64: 36, 32>}, {transform_indices = @transform_4, window_bounds = array<i64: 1, 32>}, {transform_indices = @transform_5, window_bounds = array<i64: 1, 32>}, {transform_indices = @transform_6, window_bounds = array<i64: 1, 8, 16, 32>}]} {
    %cst = arith.constant 0.000000e+00 : f32
    %0 = vector.broadcast %cst : f32 to vector<10x1x4xf32>
    %c0 = arith.constant 0 : index
    %c0_0 = arith.constant 0 : index
    %c0_1 = arith.constant 0 : index
    %1 = vector.load %arg10[%c0, %c0_0, %c0_1] : memref<10x18x4xf32, #tpu.memory_space<vmem>>, vector<10x1x4xf32>
    tpu.vector_store %arg10[%c0, %c0_0, %c0_1], %0 {strides = array<i32>} : memref<10x18x4xf32, #tpu.memory_space<vmem>>, vector<10x1x4xf32>,
    %cst_2 = arith.constant 0.000000e+00 : f32
    %2 = vector.broadcast %cst_2 : f32 to vector<10x1x4xf32>
    %c0_3 = arith.constant 0 : index
    %c17 = arith.constant 17 : index
    %c0_4 = arith.constant 0 : index
    %3 = vector.load %arg10[%c0_3, %c17, %c0_4] : memref<10x18x4xf32, #tpu.memory_space<vmem>>, vector<10x1x4xf32>
    tpu.vector_store %arg10[%c0_3, %c17, %c0_4], %2 {strides = array<i32>} : memref<10x18x4xf32, #tpu.memory_space<vmem>>, vector<10x1x4xf32>,
    %c0_5 = arith.constant 0 : index
    %c0_6 = arith.constant 0 : index
    %c0_7 = arith.constant 0 : index
    %c0_8 = arith.constant 0 : index
    %4 = vector.load %arg4[%c0_5, %c0_6, %c0_7, %c0_8] : memref<1x8x16x4xf32, #tpu.memory_space<vmem>>, vector<1x8x16x4xf32>
    %5 = vector.shape_cast %4 : vector<1x8x16x4xf32> to vector<8x16x4xf32>
    %c1 = arith.constant 1 : index
    %c1_9 = arith.constant 1 : index
    %c0_10 = arith.constant 0 : index
    %6 = vector.load %arg10[%c1, %c1_9, %c0_10] : memref<10x18x4xf32, #tpu.memory_space<vmem>>, vector<8x16x4xf32>
    tpu.vector_store %arg10[%c1, %c1_9, %c0_10], %5 {strides = array<i32>} : memref<10x18x4xf32, #tpu.memory_space<vmem>>, vector<8x16x4xf32>,
    %c0_11 = arith.constant 0 : index
    %c0_12 = arith.constant 0 : index
    %c0_13 = arith.constant 0 : index
    %c0_14 = arith.constant 0 : index
    %7 = vector.load %arg3[%c0_11, %c0_12, %c0_13, %c0_14] : memref<1x1x16x4xf32, #tpu.memory_space<vmem>>, vector<1x1x16x4xf32>
    %8 = vector.shape_cast %7 : vector<1x1x16x4xf32> to vector<1x16x4xf32>
    %c0_15 = arith.constant 0 : index
    %c1_16 = arith.constant 1 : index
    %c0_17 = arith.constant 0 : index
    %9 = vector.load %arg10[%c0_15, %c1_16, %c0_17] : memref<10x18x4xf32, #tpu.memory_space<vmem>>, vector<1x16x4xf32>
    tpu.vector_store %arg10[%c0_15, %c1_16, %c0_17], %8 {strides = array<i32>} : memref<10x18x4xf32, #tpu.memory_space<vmem>>, vector<1x16x4xf32>,
    %c0_18 = arith.constant 0 : index
    %c0_19 = arith.constant 0 : index
    %c0_20 = arith.constant 0 : index
    %c0_21 = arith.constant 0 : index
    %10 = vector.load %arg5[%c0_18, %c0_19, %c0_20, %c0_21] : memref<1x1x16x4xf32, #tpu.memory_space<vmem>>, vector<1x1x16x4xf32>
    %11 = vector.shape_cast %10 : vector<1x1x16x4xf32> to vector<1x16x4xf32>
    %c9 = arith.constant 9 : index
    %c1_22 = arith.constant 1 : index
    %c0_23 = arith.constant 0 : index
    %12 = vector.load %arg10[%c9, %c1_22, %c0_23] : memref<10x18x4xf32, #tpu.memory_space<vmem>>, vector<1x16x4xf32>
    tpu.vector_store %arg10[%c9, %c1_22, %c0_23], %11 {strides = array<i32>} : memref<10x18x4xf32, #tpu.memory_space<vmem>>, vector<1x16x4xf32>,
    %c0_i32 = arith.constant 0 : i32
    %13 = arith.cmpi eq, %arg2, %c0_i32 : i32
    %14 = arith.extui %13 : i1 to i32
    %c0_i32_24 = arith.constant 0 : i32
    %15 = arith.cmpi ne, %14, %c0_i32_24 : i32
    scf.if %15 {
      %cst_86 = arith.constant 0.000000e+00 : f32
      %53 = vector.broadcast %cst_86 : f32 to vector<1x16x4xf32>
      %c0_87 = arith.constant 0 : index
      %c1_88 = arith.constant 1 : index
      %c0_89 = arith.constant 0 : index
      %54 = vector.load %arg10[%c0_87, %c1_88, %c0_89] : memref<10x18x4xf32, #tpu.memory_space<vmem>>, vector<1x16x4xf32>
      tpu.vector_store %arg10[%c0_87, %c1_88, %c0_89], %53 {strides = array<i32>} : memref<10x18x4xf32, #tpu.memory_space<vmem>>, vector<1x16x4xf32>,
    } else {
    }
    %c1_i32 = arith.constant 1 : i32
    %16 = arith.cmpi eq, %arg2, %c1_i32 : i32
    %17 = arith.extui %16 : i1 to i32
    %c0_i32_25 = arith.constant 0 : i32
    %18 = arith.cmpi ne, %17, %c0_i32_25 : i32
    scf.if %18 {
      %cst_86 = arith.constant 0.000000e+00 : f32
      %53 = vector.broadcast %cst_86 : f32 to vector<1x16x4xf32>
      %c9_87 = arith.constant 9 : index
      %c1_88 = arith.constant 1 : index
      %c0_89 = arith.constant 0 : index
      %54 = vector.load %arg10[%c9_87, %c1_88, %c0_89] : memref<10x18x4xf32, #tpu.memory_space<vmem>>, vector<1x16x4xf32>
      tpu.vector_store %arg10[%c9_87, %c1_88, %c0_89], %53 {strides = array<i32>} : memref<10x18x4xf32, #tpu.memory_space<vmem>>, vector<1x16x4xf32>,
    } else {
    }
    %c0_26 = arith.constant 0 : index
    %c0_27 = arith.constant 0 : index
    %c0_28 = arith.constant 0 : index
    %19 = vector.load %arg10[%c0_26, %c0_27, %c0_28] : memref<10x18x4xf32, #tpu.memory_space<vmem>>, vector<8x16x4xf32>
    %c0_29 = arith.constant 0 : index
    %c0_30 = arith.constant 0 : index
    %c0_31 = arith.constant 0 : index
    %20 = vector.load %arg11[%c0_29, %c0_30, %c0_31] : memref<8x16x36xf32, #tpu.memory_space<vmem>>, vector<8x16x4xf32>
    tpu.vector_store %arg11[%c0_29, %c0_30, %c0_31], %19 {strides = array<i32>} : memref<8x16x36xf32, #tpu.memory_space<vmem>>, vector<8x16x4xf32>,
    %c0_32 = arith.constant 0 : index
    %c1_33 = arith.constant 1 : index
    %c0_34 = arith.constant 0 : index
    %21 = vector.load %arg10[%c0_32, %c1_33, %c0_34] : memref<10x18x4xf32, #tpu.memory_space<vmem>>, vector<8x16x4xf32>
    %c0_35 = arith.constant 0 : index
    %c0_36 = arith.constant 0 : index
    %c4 = arith.constant 4 : index
    %22 = vector.load %arg11[%c0_35, %c0_36, %c4] : memref<8x16x36xf32, #tpu.memory_space<vmem>>, vector<8x16x4xf32>
    tpu.vector_store %arg11[%c0_35, %c0_36, %c4], %21 {strides = array<i32>} : memref<8x16x36xf32, #tpu.memory_space<vmem>>, vector<8x16x4xf32>,
    %c0_37 = arith.constant 0 : index
    %c2 = arith.constant 2 : index
    %c0_38 = arith.constant 0 : index
    %23 = vector.load %arg10[%c0_37, %c2, %c0_38] : memref<10x18x4xf32, #tpu.memory_space<vmem>>, vector<8x16x4xf32>
    %c0_39 = arith.constant 0 : index
    %c0_40 = arith.constant 0 : index
    %c8 = arith.constant 8 : index
    %24 = vector.load %arg11[%c0_39, %c0_40, %c8] : memref<8x16x36xf32, #tpu.memory_space<vmem>>, vector<8x16x4xf32>
    tpu.vector_store %arg11[%c0_39, %c0_40, %c8], %23 {strides = array<i32>} : memref<8x16x36xf32, #tpu.memory_space<vmem>>, vector<8x16x4xf32>,
    %c1_41 = arith.constant 1 : index
    %c0_42 = arith.constant 0 : index
    %c0_43 = arith.constant 0 : index
    %25 = vector.load %arg10[%c1_41, %c0_42, %c0_43] : memref<10x18x4xf32, #tpu.memory_space<vmem>>, vector<8x16x4xf32>
    %c0_44 = arith.constant 0 : index
    %c0_45 = arith.constant 0 : index
    %c12 = arith.constant 12 : index
    %26 = vector.load %arg11[%c0_44, %c0_45, %c12] : memref<8x16x36xf32, #tpu.memory_space<vmem>>, vector<8x16x4xf32>
    tpu.vector_store %arg11[%c0_44, %c0_45, %c12], %25 {strides = array<i32>} : memref<8x16x36xf32, #tpu.memory_space<vmem>>, vector<8x16x4xf32>,
    %c1_46 = arith.constant 1 : index
    %c1_47 = arith.constant 1 : index
    %c0_48 = arith.constant 0 : index
    %27 = vector.load %arg10[%c1_46, %c1_47, %c0_48] : memref<10x18x4xf32, #tpu.memory_space<vmem>>, vector<8x16x4xf32>
    %c0_49 = arith.constant 0 : index
    %c0_50 = arith.constant 0 : index
    %c16 = arith.constant 16 : index
    %28 = vector.load %arg11[%c0_49, %c0_50, %c16] : memref<8x16x36xf32, #tpu.memory_space<vmem>>, vector<8x16x4xf32>
    tpu.vector_store %arg11[%c0_49, %c0_50, %c16], %27 {strides = array<i32>} : memref<8x16x36xf32, #tpu.memory_space<vmem>>, vector<8x16x4xf32>,
    %c1_51 = arith.constant 1 : index
    %c2_52 = arith.constant 2 : index
    %c0_53 = arith.constant 0 : index
    %29 = vector.load %arg10[%c1_51, %c2_52, %c0_53] : memref<10x18x4xf32, #tpu.memory_space<vmem>>, vector<8x16x4xf32>
    %c0_54 = arith.constant 0 : index
    %c0_55 = arith.constant 0 : index
    %c20 = arith.constant 20 : index
    %30 = vector.load %arg11[%c0_54, %c0_55, %c20] : memref<8x16x36xf32, #tpu.memory_space<vmem>>, vector<8x16x4xf32>
    tpu.vector_store %arg11[%c0_54, %c0_55, %c20], %29 {strides = array<i32>} : memref<8x16x36xf32, #tpu.memory_space<vmem>>, vector<8x16x4xf32>,
    %c2_56 = arith.constant 2 : index
    %c0_57 = arith.constant 0 : index
    %c0_58 = arith.constant 0 : index
    %31 = vector.load %arg10[%c2_56, %c0_57, %c0_58] : memref<10x18x4xf32, #tpu.memory_space<vmem>>, vector<8x16x4xf32>
    %c0_59 = arith.constant 0 : index
    %c0_60 = arith.constant 0 : index
    %c24 = arith.constant 24 : index
    %32 = vector.load %arg11[%c0_59, %c0_60, %c24] : memref<8x16x36xf32, #tpu.memory_space<vmem>>, vector<8x16x4xf32>
    tpu.vector_store %arg11[%c0_59, %c0_60, %c24], %31 {strides = array<i32>} : memref<8x16x36xf32, #tpu.memory_space<vmem>>, vector<8x16x4xf32>,
    %c2_61 = arith.constant 2 : index
    %c1_62 = arith.constant 1 : index
    %c0_63 = arith.constant 0 : index
    %33 = vector.load %arg10[%c2_61, %c1_62, %c0_63] : memref<10x18x4xf32, #tpu.memory_space<vmem>>, vector<8x16x4xf32>
    %c0_64 = arith.constant 0 : index
    %c0_65 = arith.constant 0 : index
    %c28 = arith.constant 28 : index
    %34 = vector.load %arg11[%c0_64, %c0_65, %c28] : memref<8x16x36xf32, #tpu.memory_space<vmem>>, vector<8x16x4xf32>
    tpu.vector_store %arg11[%c0_64, %c0_65, %c28], %33 {strides = array<i32>} : memref<8x16x36xf32, #tpu.memory_space<vmem>>, vector<8x16x4xf32>,
    %c2_66 = arith.constant 2 : index
    %c2_67 = arith.constant 2 : index
    %c0_68 = arith.constant 0 : index
    %35 = vector.load %arg10[%c2_66, %c2_67, %c0_68] : memref<10x18x4xf32, #tpu.memory_space<vmem>>, vector<8x16x4xf32>
    %c0_69 = arith.constant 0 : index
    %c0_70 = arith.constant 0 : index
    %c32 = arith.constant 32 : index
    %36 = vector.load %arg11[%c0_69, %c0_70, %c32] : memref<8x16x36xf32, #tpu.memory_space<vmem>>, vector<8x16x4xf32>
    tpu.vector_store %arg11[%c0_69, %c0_70, %c32], %35 {strides = array<i32>} : memref<8x16x36xf32, #tpu.memory_space<vmem>>, vector<8x16x4xf32>,
    %c0_71 = arith.constant 0 : index
    %c0_72 = arith.constant 0 : index
    %c0_73 = arith.constant 0 : index
    %37 = vector.load %arg11[%c0_71, %c0_72, %c0_73] : memref<8x16x36xf32, #tpu.memory_space<vmem>>, vector<8x16x36xf32>
    %38 = vector.shape_cast %37 : vector<8x16x36xf32> to vector<128x36xf32>
    %c0_74 = arith.constant 0 : index
    %c0_75 = arith.constant 0 : index
    %39 = vector.load %arg6[%c0_74, %c0_75] : memref<36x32xf32, #tpu.memory_space<vmem>>, vector<36x32xf32>
    %cst_76 = arith.constant dense<0.000000e+00> : vector<128x32xf32>
    %40 = tpu.matmul %38, %39, %cst_76 {dimension_numbers = #tpu.dot_dimension_numbers<[1], [0], [0], [1], [0, 0, 1, 1], [], []>} : vector<128x36xf32>, vector<36x32xf32>, vector<128x32xf32> -> vector<128x32xf32>
    %c0_77 = arith.constant 0 : index
    %c0_78 = arith.constant 0 : index
    %41 = vector.load %arg7[%c0_77, %c0_78] : memref<1x32xf32, #tpu.memory_space<vmem>>, vector<1x32xf32>
    %42 = vector.broadcast %41 : vector<1x32xf32> to vector<128x32xf32>
    %43 = arith.mulf %40, %42 : vector<128x32xf32>
    %c0_79 = arith.constant 0 : index
    %c0_80 = arith.constant 0 : index
    %44 = vector.load %arg8[%c0_79, %c0_80] : memref<1x32xf32, #tpu.memory_space<vmem>>, vector<1x32xf32>
    %45 = vector.broadcast %44 : vector<1x32xf32> to vector<128x32xf32>
    %46 = arith.addf %43, %45 : vector<128x32xf32>
    %cst_81 = arith.constant 0.000000e+00 : f32
    %47 = vector.broadcast %cst_81 : f32 to vector<128x32xf32>
    %48 = arith.maximumf %46, %47 : vector<128x32xf32>
    %49 = vector.shape_cast %48 : vector<128x32xf32> to vector<8x16x32xf32>
    %c0_82 = arith.constant 0 : index
    %c0_83 = arith.constant 0 : index
    %c0_84 = arith.constant 0 : index
    %c0_85 = arith.constant 0 : index
    %50 = vector.load %arg9[%c0_82, %c0_83, %c0_84, %c0_85] : memref<1x8x16x32xf32, #tpu.memory_space<vmem>>, vector<1x8x16x32xf32>
    %51 = vector.shape_cast %50 : vector<1x8x16x32xf32> to vector<8x16x32xf32>
    %52 = vector.shape_cast %49 : vector<8x16x32xf32> to vector<1x8x16x32xf32>
    tpu.vector_store %arg9[%c0_82, %c0_83, %c0_84, %c0_85], %52 {strides = array<i32>} : memref<1x8x16x32xf32, #tpu.memory_space<vmem>>, vector<1x8x16x32xf32>,
    return
  }
  func.func @transform_0(%arg0: i32, %arg1: i32, %arg2: i32) -> (i32, i32, i32, i32) {
    %c8_i32 = arith.constant 8 : i32
    %0 = arith.muli %arg2, %c8_i32 : i32
    %c1_i32 = arith.constant 1 : i32
    %1 = arith.subi %0, %c1_i32 : i32
    %c0_i32 = arith.constant 0 : i32
    %2 = arith.maxsi %1, %c0_i32 : i32
    %c0_i32_0 = arith.constant 0 : i32
    %c0_i32_1 = arith.constant 0 : i32
    %c0_i32_2 = arith.constant 0 : i32
    return %arg0, %2, %c0_i32_0, %c0_i32_1 : i32, i32, i32, i32
  }
  func.func @transform_1(%arg0: i32, %arg1: i32, %arg2: i32) -> (i32, i32, i32, i32) {
    %c0_i32 = arith.constant 0 : i32
    %c0_i32_0 = arith.constant 0 : i32
    %c0_i32_1 = arith.constant 0 : i32
    return %arg0, %arg2, %c0_i32, %c0_i32_0 : i32, i32, i32, i32
  }
  func.func @transform_2(%arg0: i32, %arg1: i32, %arg2: i32) -> (i32, i32, i32, i32) {
    %c8_i32 = arith.constant 8 : i32
    %0 = arith.muli %arg2, %c8_i32 : i32
    %c8_i32_0 = arith.constant 8 : i32
    %1 = arith.addi %0, %c8_i32_0 : i32
    %c15_i32 = arith.constant 15 : i32
    %2 = arith.minsi %1, %c15_i32 : i32
    %c0_i32 = arith.constant 0 : i32
    %c0_i32_1 = arith.constant 0 : i32
    %c0_i32_2 = arith.constant 0 : i32
    return %arg0, %2, %c0_i32, %c0_i32_1 : i32, i32, i32, i32
  }
  func.func @transform_3(%arg0: i32, %arg1: i32, %arg2: i32) -> (i32, i32) {
    %c0_i32 = arith.constant 0 : i32
    %c0_i32_0 = arith.constant 0 : i32
    return %c0_i32, %arg1 : i32, i32
  }
  func.func @transform_4(%arg0: i32, %arg1: i32, %arg2: i32) -> (i32, i32) {
    %c0_i32 = arith.constant 0 : i32
    %c0_i32_0 = arith.constant 0 : i32
    return %c0_i32, %arg1 : i32, i32
  }
  func.func @transform_5(%arg0: i32, %arg1: i32, %arg2: i32) -> (i32, i32) {
    %c0_i32 = arith.constant 0 : i32
    %c0_i32_0 = arith.constant 0 : i32
    return %c0_i32, %arg1 : i32, i32
  }
  func.func @transform_6(%arg0: i32, %arg1: i32, %arg2: i32) -> (i32, i32, i32, i32) {
    %c0_i32 = arith.constant 0 : i32
    %c0_i32_0 = arith.constant 0 : i32
    return %arg0, %arg2, %c0_i32, %arg1 : i32, i32, i32, i32
  }
}

</mosaic_0001>

<bundles_post_ra>
// kernel: tile.19
= control target key start
LH: loop header
LB: loop body
LE: loop exit
PB: predicated region body
PF: predicated region fallthrough
CT: control target
= control target key end

     0   :  { %vm8_vm0 = vcmask 64512   ;;  %s40_s8 = smov 8   ;;  %s41_s9 = smov 16   ;;  %vm14_vm1 = vcmask 261312   ;;  %vm20_vm2 = vcmask 195712   ;;  %vm26_vm3 = vcmask 130112   ;;  %s58_s0 = inlined_call_operand.vmem [shape: f32[4,8], index: 0, kind: input, shape index: {}]   ;;  %s59_s1 = inlined_call_operand.vmem [shape: f32[1,32], index: 1, kind: output, shape index: {}]  }
   0x1   :  { %v5_v0 = vld [vmem:[%s58_s0] sm:$0xf]  ;;  %s39_s0 = smov 24  }
   0x2   :  { %6 = vst [vmem:[#allocation1] sm:$0xf] %v5_v0 }
   0x9   :  { %v11_v1 = vld [vmem:[#allocation1 + $0x3] sm:$0x1]   ;;  %v23_v2 = vld [vmem:[#allocation1 + $0x1] sm:$0x1]   ;;  %v7_v3 = vld [vmem:[#allocation1] sm:$0x1]  }
   0xa   :  { %12 = vrot.lane.b32.xlu0 %v11_v1, %s39_s0  ;;  %24 = vrot.lane.b32.xlu1 %v23_v2, %s40_s8  ;;  %v17_v4 = vld [vmem:[#allocation1 + $0x2] sm:$0x1]   ;;  %9 = vst.msk [vmem:[#allocation0] sm:$0x1] %vm8_vm0, %v7_v3  }
   0xe   :  { %18 = vrot.lane.b32.xlu0 %v17_v4, %s41_s9 }
  0x7c   :  { %v13_v5 = vpop.permute.xlu0 %12   ;;  %v25_v6 = vpop.permute.xlu1 %24  }
  0x7d   :  { %15 = vst.msk [vmem:[#allocation0] sm:$0x1] %vm14_vm1, %v13_v5  }
  0x80   :  { %v19_v7 = vpop.permute.xlu0 %18  }
  0x81   :  { %21 = vst.msk [vmem:[#allocation0] sm:$0x1] %vm20_vm2, %v19_v7  }
  0x82   :  { %27 = vst.msk [vmem:[#allocation0] sm:$0x1] %vm26_vm3, %v25_v6  }
  0x89   :  { %v32_v8 = vld [vmem:[#allocation0] sm:$0x1] }
  0x8a   :  { %35 = vst [vmem:[%s59_s1] sm:$0x1] %v32_v8 }

// kernel: tile.18
= control target key start
LH: loop header
LB: loop body
LE: loop exit
PB: predicated region body
PF: predicated region fallthrough
CT: control target
= control target key end

     0   :  { %s22_s0 = inlined_call_operand.vmem [shape: f32[8], index: 0, kind: input, shape index: {}]   ;;  %s23_s1 = inlined_call_operand.vmem [shape: f32[4,8], index: 1, kind: output, shape index: {}]  }
   0x1   :  { %v4_v0 = vld [vmem:[%s22_s0] ss:$0 sm:$0xff] }
   0x2   :  { %5 = vst [vmem:[%s23_s1] sm:$0xf] %v4_v0 }

// kernel: up_conv_forward.1
= control target key start
LH: loop header
LB: loop body
LE: loop exit
PB: predicated region body
PF: predicated region fallthrough
CT: control target
= control target key end

     0   :  { %s2122_s21 = smov 0   ;;  %s2124_s22 = smov 0   ;;  %s2757_s0 = inlined_call_operand.vmem [shape: f32[2,16,16,4], index: 0, kind: input, shape index: {}, may-alias: {0,1,2}]   ;;  %s2758_s1 = inlined_call_operand.vmem [shape: f32[2,16,16,4], index: 1, kind: input, shape index: {}, may-alias: {0,1,2}]   ;;  %s2759_s2 = inlined_call_operand.vmem [shape: f32[2,16,16,4], index: 2, kind: input, shape index: {}, may-alias: {0,1,2}]   ;;  %s2760_s3 = inlined_call_operand.vmem [shape: f32[36,32], index: 3, kind: input, shape index: {}]   ;;  %s2761_s4 = inlined_call_operand.vmem [shape: f32[1,32], index: 4, kind: input, shape index: {}]   ;;  %s2762_s5 = inlined_call_operand.vmem [shape: f32[1,32], index: 5, kind: input, shape index: {}]   ;;  %s2763_s6 = inlined_call_operand.vmem [shape: f32[2,16,16,32], index: 6, kind: output, shape index: {}]  }
   0x1   :  { %s2126_s23 = smov 0   ;;  %s2128_s24 = smov 0  }
   0x2   :  { %s2130_s25 = smov 0  }
   0x3 LB: > { %s28_s26 = sadd.s32 1, %s2066_s23  ;;  %s35_s27 = sadd.s32 1, %s2070_s24  ;;  %s2074_s25 = sphi %s2130_s25, %s16_s25   ;;  %s2070_s24 = sphi %s2128_s24, %s2768_s24   ;;  %s2066_s23 = sphi %s2126_s23, %s2767_s23   ;;  %s2062_s22 = sphi %s2124_s22, %s2766_s22   ;;  %s2058_s21 = sphi %s2122_s21, %s2765_s21  }
   0x4   : > { %p29_p0 = scmp.ge.s32.totalorder %s28_s26, 2  ;;  %p1869_p1 = scmp.ge.s32.totalorder %s2074_s25, 1 }
   0x5   : > { %p332_p2 = scmp.lt.s32.totalorder %s2074_s25, 5 }
   0x6   : > { %s2770_s26 = smov (%p29_p0, %s28_s26), 0  ;;  %s2772_s27 = smov (!%p29_p0, %s35_s27), %s2070_s24 }
   0x7   : > { %p333_p3 = pnand %p1869_p1, %p332_p2  ;;  %p37_p4 = scmp.ge.s32.totalorder %s2772_s27, 2 }
   0x8   : > { %s2157_s28 = sshll.u32 (!%p333_p3), %s2058_s21, 3  ;;  %p415_p5 = scmp.lt.s32.totalorder (!%p333_p3), %s2062_s22, 1 }
   0x9   : > { %s2774_s27 = smov (%p37_p4, %s2772_s27), 0  ;;  %336 = sbr.rel (%p333_p3) target bundleno = 625 (0x271), region = 44 }
   0xa   : > { %p431_p6 = scmp.lt.s32.totalorder (!%p333_p3), %s2157_s28, 15  ;;  %s2182_s29 = sadd.s32 (!%p333_p3), 4294967295, %s2157_s28 }
   0xb   : > { %p413_p7 = scmp.gt.s32.totalorder (!%p333_p3), %s2182_s29, 0  ;;  %p1872_p8 = scmp.lt.s32.totalorder (!%p333_p3), %s2182_s29, 15 }
   0xc   : > { %s440_s10 = sadd.s32 (!%p333_p3), 8, %s2157_s28  ;;  %p1895_p10 = scmp.ne.s32.totalorder (!%p333_p3), %s2058_s21, 0 }
   0xd   : > { %p2194_p9 = scmp.lt.s32.totalorder (!%p333_p3), %s440_s10, 15 }
   0xe   : > { %vm480_vm0 = vcmask 24576   ;;  %v2076_v0 = vmov 0.0   ;;  %s2776_s22 = smov (!%p415_p5, %s2062_s22), 1  ;;  %vm518_vm1 = vcmask 31744  }
   0xf   : > { %481 = vst.msk [vmem:[#allocation2] sm:$0x1] %vm480_vm0, %v2076_v0  ;;  %482 = vst.msk [vmem:[#allocation2 + $0x18] sm:$0x1] %vm480_vm0, %v2076_v0  ;;  %s432_s30 = scalar_select %p431_p6, %s2157_s28, 15 }
  0x10   : > { %483 = vst.msk [vmem:[#allocation2 + $0x30] sm:$0x1] %vm480_vm0, %v2076_v0  ;;  %484 = vst.msk [vmem:[#allocation2 + $0x48] sm:$0x1] %vm480_vm0, %v2076_v0  ;;  %s2188_s7 = sshll.u32 %s2776_s22, 5  ;;  %s2778_s10 = smov (!%p2194_p9, %s440_s10), 15 }
  0x11   : > { %485 = vst.msk [vmem:[#allocation2 + $0x60] sm:$0x1] %vm480_vm0, %v2076_v0  ;;  %486 = vst.msk [vmem:[#allocation2 + $0x78] sm:$0x1] %vm480_vm0, %v2076_v0  ;;  %s1881_s8 = sshll.u32 %s432_s30, 1  ;;  %s2782_s10 = smov (!%p2194_p9, %s2778_s10), 15 }
  0x12   : > { %487 = vst.msk [vmem:[#allocation2 + $0x90] sm:$0x1] %vm480_vm0, %v2076_v0  ;;  %488 = vst.msk [vmem:[#allocation2 + $0xa8] sm:$0x1] %vm480_vm0, %v2076_v0  ;;  %s435_s9 = sadd.s32 %s1881_s8, %s2188_s7  ;;  %s1888_s28 = sshll.u32 %s2782_s10, 1 }
  0x13   : > { %489 = vst.msk [vmem:[#allocation2 + $0xc0] sm:$0x1] %vm480_vm0, %v2076_v0  ;;  %490 = vst.msk [vmem:[#allocation2 + $0xd8] sm:$0x1] %vm480_vm0, %v2076_v0  ;;  %s1883_s11 = sshll.u32 %s435_s9, 3  ;;  %s449_s30 = sadd.s32 %s1888_s28, %s2188_s7 }
  0x14   : > { %491 = vst.msk [vmem:[#allocation2 + $0x11] sm:$0x1] %vm480_vm0, %v2076_v0  ;;  %492 = vst.msk [vmem:[#allocation2 + $0x29] sm:$0x1] %vm480_vm0, %v2076_v0  ;;  %s2201_s15 = scalar_lea.vmem %s2758_s1, %s1883_s11  ;;  %s2206_s18 = scalar_lea.vmem %s2763_s6, %s1883_s11 }
  0x15   : > { %493 = vst.msk [vmem:[#allocation2 + $0x41] sm:$0x1] %vm480_vm0, %v2076_v0  ;;  %494 = vst.msk [vmem:[#allocation2 + $0x59] sm:$0x1] %vm480_vm0, %v2076_v0  ;;  %v501_v1 = vld [vmem:[%s2201_s15] sm:$0xff]  ;;  %v502_v2 = vld [vmem:[%s2201_s15 + $0x8] sm:$0xff] }
  0x16   : > { %495 = vst.msk [vmem:[#allocation2 + $0x71] sm:$0x1] %vm480_vm0, %v2076_v0  ;;  %496 = vst.msk [vmem:[#allocation2 + $0x89] sm:$0x1] %vm480_vm0, %v2076_v0  ;;  %v503_v3 = vld [vmem:[%s2201_s15 + $0x10] sm:$0xff]  ;;  %s414_s19 = scalar_select %p413_p7, %s2182_s29, 0 }
  0x17   : > { %497 = vst.msk [vmem:[#allocation2 + $0xa1] sm:$0x1] %vm480_vm0, %v2076_v0  ;;  %498 = vst.msk [vmem:[#allocation2 + $0xb9] sm:$0x1] %vm480_vm0, %v2076_v0  ;;  %v504_v4 = vld [vmem:[%s2201_s15 + $0x18] sm:$0xff]  ;;  %v505_v5 = vld [vmem:[%s2201_s15 + $0x20] sm:$0xff] }
  0x18   : > { %499 = vst.msk [vmem:[#allocation2 + $0xd1] sm:$0x1] %vm480_vm0, %v2076_v0  ;;  %500 = vst.msk [vmem:[#allocation2 + $0xe9] sm:$0x1] %vm480_vm0, %v2076_v0  ;;  %v506_v6 = vld [vmem:[%s2201_s15 + $0x28] sm:$0xff]  ;;  %v507_v7 = vld [vmem:[%s2201_s15 + $0x30] sm:$0xff] }
  0x19   : > { %519 = vst.msk [vmem:[#allocation2 + $0x19] sm:$0xff] %vm518_vm1, %v501_v1  ;;  %520 = vst.msk [vmem:[#allocation2 + $0x21] sm:$0xff] %vm518_vm1, %v502_v2  ;;  %v508_v8 = vld [vmem:[%s2201_s15 + $0x38] sm:$0xff]  ;;  %v509_v9 = vld [vmem:[%s2201_s15 + $0x40] sm:$0xff]  ;;  %s2780_s19 = smov (!%p1872_p8, %s414_s19), 15  ;;  %s1890_s12 = sshll.u32 %s449_s30, 3 }
  0x1a   : > { %521 = vst.msk [vmem:[#allocation2 + $0x31] sm:$0xff] %vm518_vm1, %v503_v3  ;;  %522 = vst.msk [vmem:[#allocation2 + $0x39] sm:$0xff] %vm518_vm1, %v504_v4  ;;  %v510_v10 = vld [vmem:[%s2201_s15 + $0x48] sm:$0xff]  ;;  %v511_v11 = vld [vmem:[%s2201_s15 + $0x50] sm:$0xff]  ;;  %s1877_s20 = sshll.u32 %s2780_s19, 1  ;;  %s451_s16 = scalar_lea.vmem %s2759_s2, %s1890_s12 }
  0x1b   : > { %523 = vst.msk [vmem:[#allocation2 + $0x49] sm:$0xff] %vm518_vm1, %v505_v5  ;;  %524 = vst.msk [vmem:[#allocation2 + $0x51] sm:$0xff] %vm518_vm1, %v506_v6  ;;  %v512_v12 = vld [vmem:[%s2201_s15 + $0x58] sm:$0xff]  ;;  %v513_v13 = vld [vmem:[%s2201_s15 + $0x60] sm:$0xff]  ;;  %s421_s22 = sadd.s32 %s2188_s7, %s1877_s20 }
  0x1c   : > { %525 = vst.msk [vmem:[#allocation2 + $0x61] sm:$0xff] %vm518_vm1, %v507_v7  ;;  %526 = vst.msk [vmem:[#allocation2 + $0x69] sm:$0xff] %vm518_vm1, %v508_v8  ;;  %v514_v14 = vld [vmem:[%s2201_s15 + $0x68] sm:$0xff]  ;;  %v515_v15 = vld [vmem:[%s2201_s15 + $0x70] sm:$0xff]  ;;  %s1879_s29 = sshll.u32 %s421_s22, 3 }
  0x1d   : > { %527 = vst.msk [vmem:[#allocation2 + $0x79] sm:$0xff] %vm518_vm1, %v509_v9  ;;  %528 = vst.msk [vmem:[#allocation2 + $0x81] sm:$0xff] %vm518_vm1, %v510_v10  ;;  %v516_v16 = vld [vmem:[%s2201_s15 + $0x78] sm:$0xff]  ;;  %s423_s11 = scalar_lea.vmem %s2757_s0, %s1879_s29  ;;  %v539_v19 = vld [vmem:[%s451_s16] sm:$0xff] }
  0x1e   : > { %529 = vst.msk [vmem:[#allocation2 + $0x91] sm:$0xff] %vm518_vm1, %v511_v11  ;;  %530 = vst.msk [vmem:[#allocation2 + $0x99] sm:$0xff] %vm518_vm1, %v512_v12  ;;  %v535_v17 = vld [vmem:[%s423_s11] sm:$0xff]  ;;  %v536_v18 = vld [vmem:[%s423_s11 + $0x8] sm:$0xff]  ;;  %547 = sbr.rel (%p1895_p10) target bundleno = 37 (0x25), region = 48 }
  0x1f   : > { %531 = vst.msk [vmem:[#allocation2 + $0xa9] sm:$0xff] %vm518_vm1, %v513_v13  ;;  %532 = vst.msk [vmem:[#allocation2 + $0xb1] sm:$0xff] %vm518_vm1, %v514_v14  ;;  %v540_v20 = vld [vmem:[%s451_s16 + $0x8] sm:$0xff] }
  0x20   : > { %533 = vst.msk [vmem:[#allocation2 + $0xc1] sm:$0xff] %vm518_vm1, %v515_v15  ;;  %534 = vst.msk [vmem:[#allocation2 + $0xc9] sm:$0xff] %vm518_vm1, %v516_v16 }
  0x21   : > { %537 = vst.msk [vmem:[#allocation2 + $0x1] sm:$0xff] %vm518_vm1, %v535_v17  ;;  %538 = vst.msk [vmem:[#allocation2 + $0x9] sm:$0xff] %vm518_vm1, %v536_v18 }
  0x22   : > { %542 = vst.msk [vmem:[#allocation2 + $0xd9] sm:$0xff] %vm518_vm1, %v539_v19  ;;  %543 = vst.msk [vmem:[#allocation2 + $0xe1] sm:$0xff] %vm518_vm1, %v540_v20 }
  0x23   : > { %v2077_v21 = vmov 0.0  }
  0x24   : > { %548 = vst.msk [vmem:[#allocation2 + $0x1] sm:$0xff] %vm518_vm1, %v2077_v21  ;;  %549 = vst.msk [vmem:[#allocation2 + $0x9] sm:$0xff] %vm518_vm1, %v2077_v21 }
  0x25 PF: > { %p1896_p11 = scmp.ne.s32.totalorder %s2058_s21, 1 }
  0x27   : > { %553 = sbr.rel (%p1896_p11) target bundleno = 46 (0x2e), region = 52 }
  0x2c   : > { %v2078_v22 = vmov 0.0  }
  0x2d   : > { %554 = vst.msk [vmem:[#allocation2 + $0xd9] sm:$0xff] %vm518_vm1, %v2078_v22  ;;  %555 = vst.msk [vmem:[#allocation2 + $0xe1] sm:$0xff] %vm518_vm1, %v2078_v22 }
  0x2e PF: > { %v589_v23 = vld [vmem:[#allocation2 + $0x9] sm:$0xff]  ;;  %v588_v24 = vld [vmem:[#allocation2 + $0x1] sm:$0xff]  ;;  %s2079_s7 = smov 4   ;;  %v2271_v27 = vld [vmem:[#allocation2 + $0x78] sm:$0xff]  ;;  %s2080_s21 = smov 8   ;;  %vm1435_vm2 = vcmask 1043456  }
  0x2f   : > { %622 = vrot.lane.b32.xlu1 %v589_v23, %s2079_s7  ;;  %620 = vrot.lane.b32.xlu0 %v588_v24, %s2079_s7  ;;  %v2267_v25 = vld [vmem:[#allocation2 + $0x69] sm:$0xff]  ;;  %v2269_v26 = vld [vmem:[#allocation2 + $0x61] sm:$0xff]  ;;  %v782_v28 = vld [vmem:[#allocation2 + $0x18] sm:$0xff]  ;;  %582 = vst.msk [vmem:[#allocation3 + $0x50] sm:$0xff] %vm518_vm1, %v2271_v27  ;;  %s2081_s10 = smov 12   ;;  %s2082_s15 = smov 16  }
  0x30   : > { %v2273_v29 = vld [vmem:[#allocation2 + $0x80] sm:$0xff]  ;;  %574 = vst.msk [vmem:[#allocation3 + $0x10] sm:$0xff] %vm518_vm1, %v782_v28  ;;  %v2287_v33 = vld [vmem:[#allocation2 + $0x90] sm:$0xff]  ;;  %v2291_v35 = vld [vmem:[#allocation2 + $0x98] sm:$0xff]  ;;  %s2083_s17 = smov 20   ;;  %s2084_s19 = smov 24  }
  0x31   : > { %v783_v30 = vld [vmem:[#allocation2 + $0x20] sm:$0xff]  ;;  %583 = vst.msk [vmem:[#allocation3 + $0x58] sm:$0xff] %vm518_vm1, %v2273_v29  ;;  %v2289_v34 = vld [vmem:[#allocation2 + $0x30] sm:$0xff]  ;;  %v2293_v36 = vld [vmem:[#allocation2 + $0x38] sm:$0xff]  ;;  %s2085_s20 = smov 28   ;;  %s2086_s22 = smov 32  }
  0x32   : > { %575 = vst.msk [vmem:[#allocation3 + $0x18] sm:$0xff] %vm518_vm1, %v783_v30  ;;  %v2285_v31 = vld [vmem:[#allocation2 + $0x62] sm:$0xff]  ;;  %584 = vst.msk [vmem:[#allocation3 + $0x60] sm:$0xff] %vm518_vm1, %v2287_v33  ;;  %v2306_v37 = vld [vmem:[#allocation2 + $0x6a] sm:$0xff]  ;;  %vm668_vm3 = vcmask 64544   ;;  %vm765_vm4 = vcmask 97344  }
  0x33   : > { %638 = vrot.lane.b32.xlu1 %v2267_v25, %s2079_s7  ;;  %636 = vrot.lane.b32.xlu0 %v2269_v26, %s2079_s7  ;;  %v685_v32 = vld [vmem:[#allocation2 + $0x2] sm:$0xff]  ;;  %576 = vst.msk [vmem:[#allocation3 + $0x20] sm:$0xff] %vm518_vm1, %v2289_v34  ;;  %585 = vst.msk [vmem:[#allocation3 + $0x68] sm:$0xff] %vm518_vm1, %v2291_v35  ;;  %v686_v38 = vld [vmem:[#allocation2 + $0xa] sm:$0xff]  ;;  %vm862_vm5 = vcmask 130144   ;;  %vm959_vm6 = vcmask 162944  }
  0x34   : > { %577 = vst.msk [vmem:[#allocation3 + $0x28] sm:$0xff] %vm518_vm1, %v2293_v36  ;;  %v557_v39 = vld [vmem:[#allocation2 + $0x8] sm:$0xff]  ;;  %v556_v40 = vld [vmem:[#allocation2] sm:$0xff]  ;;  %v2318_v45 = vld [vmem:[#allocation2 + $0xb0] sm:$0xff]  ;;  %vm1056_vm7 = vcmask 195744   ;;  %vm1154_vm8 = vcmask 228544  }
  0x35   : > { %573 = vst.msk [vmem:[#allocation3 + $0x8] sm:$0xff] %vm518_vm1, %v557_v39  ;;  %v2309_v41 = vld [vmem:[#allocation2 + $0xa8] sm:$0xff]  ;;  %572 = vst.msk [vmem:[#allocation3] sm:$0xff] %vm518_vm1, %v556_v40  ;;  %v2316_v44 = vld [vmem:[#allocation2 + $0x60] sm:$0xff]  ;;  %vm1251_vm9 = vcmask 261344   ;;  %vm1348_vm10 = vcmask 294144  }
  0x36   : > { %v2311_v42 = vld [vmem:[#allocation2 + $0x48] sm:$0xff]  ;;  %586 = vst.msk [vmem:[#allocation3 + $0x70] sm:$0xff] %vm518_vm1, %v2309_v41  ;;  %580 = vst.msk [vmem:[#allocation3 + $0x40] sm:$0xff] %vm518_vm1, %v2316_v44  ;;  %v2331_v46 = vld [vmem:[#allocation2 + $0x50] sm:$0xff]  ;;  %vm1386_vm11 = vcmask 293888   ;;  %vm1646_vm12 = vcmask 261120  }
  0x37   : > { %733 = vrot.lane.b32.xlu1 %v2285_v31, %s2080_s21  ;;  %717 = vrot.lane.b32.xlu0 %v685_v32, %s2080_s21  ;;  %v2314_v43 = vld [vmem:[#allocation2 + $0x68] sm:$0xff]  ;;  %578 = vst.msk [vmem:[#allocation3 + $0x30] sm:$0xff] %vm518_vm1, %v2311_v42  ;;  %587 = vst.msk [vmem:[#allocation3 + $0x78] sm:$0xff] %vm518_vm1, %v2318_v45  ;;  %v2343_v47 = vld [vmem:[#allocation2 + $0x79] sm:$0xff] }
  0x38   : > { %581 = vst.msk [vmem:[#allocation3 + $0x48] sm:$0xff] %vm518_vm1, %v2314_v43  ;;  %579 = vst.msk [vmem:[#allocation3 + $0x38] sm:$0xff] %vm518_vm1, %v2331_v46  ;;  %v879_v48 = vld [vmem:[#allocation2 + $0x19] sm:$0xff]  ;;  %v2351_v49 = vld [vmem:[#allocation2 + $0x81] sm:$0xff] }
  0x39   : > { %v880_v50 = vld [vmem:[#allocation2 + $0x21] sm:$0xff]  ;;  %v1179_v55 = vld [vmem:[#allocation2 + $0x91] sm:$0xff]  ;;  %v1180_v57 = vld [vmem:[#allocation2 + $0x99] sm:$0xff] }
  0x3a   : > { %v2356_v51 = vld [vmem:[#allocation2 + $0x7a] sm:$0xff]  ;;  %v2367_v53 = vld [vmem:[#allocation2 + $0x82] sm:$0xff]  ;;  %v1171_v56 = vld [vmem:[#allocation2 + $0x31] sm:$0xff] }
  0x3b   : > { %735 = vrot.lane.b32.xlu1 %v2306_v37, %s2080_s21  ;;  %719 = vrot.lane.b32.xlu0 %v686_v38, %s2080_s21  ;;  %v976_v52 = vld [vmem:[#allocation2 + $0x1a] sm:$0xff]  ;;  %v977_v54 = vld [vmem:[#allocation2 + $0x22] sm:$0xff]  ;;  %v1276_v59 = vld [vmem:[#allocation2 + $0x92] sm:$0xff] }
  0x3c   : > { %v1172_v58 = vld [vmem:[#allocation2 + $0x39] sm:$0xff]  ;;  %v1383_v63 = vld [vmem:[%s2760_s3 + $0x10] sm:$0xff]  ;;  %v1382_v0 = vld [vmem:[%s2760_s3 + $0x8] sm:$0xff] }
  0x3d   : > { %v1268_v60 = vld [vmem:[#allocation2 + $0x32] sm:$0xff]  ;;  %v1385_v61 = vld [vmem:[%s2760_s3 + $0x20] sm:$0xf]  ;;  %v1181_v12 = vld [vmem:[#allocation2 + $0xa9] sm:$0xff] }
  0x3e   : > { %1941 = vmatprep.subr.msk.mxu0 %vm1435_vm2, %v1385_v61  ;;  %1975 = vmatprep.subr.msk.mxu1 %vm1435_vm2, %v1385_v61  ;;  %v1384_v62 = vld [vmem:[%s2760_s3 + $0x18] sm:$0xff]  ;;  %v1381_v1 = vld [vmem:[%s2760_s3] sm:$0xff]  ;;  %v1173_v13 = vld [vmem:[#allocation2 + $0x49] sm:$0xff] }
  0x3f   : > { %830 = vrot.lane.b32.xlu1 %v2271_v27, %s2081_s10  ;;  %814 = vrot.lane.b32.xlu0 %v782_v28, %s2081_s10  ;;  %v1277_v2 = vld [vmem:[#allocation2 + $0x9a] sm:$0xff]  ;;  %v1182_v20 = vld [vmem:[#allocation2 + $0xb1] sm:$0xff] }
  0x40   : > { %1942 = vmatpush3.msk.msra.mxu0 %vm1435_vm2, %v1385_v61  ;;  %1980 = vmatpush3.msk.msra.mxu1 %vm1435_vm2, %v1385_v61  ;;  %v1269_v3 = vld [vmem:[#allocation2 + $0x3a] sm:$0xff]  ;;  %v1174_v21 = vld [vmem:[#allocation2 + $0x51] sm:$0xff] }
  0x41   : > { %1943 = vmatprep.subr.mxu0 %v1384_v62  ;;  %1976 = vmatprep.subr.mxu1 %v1384_v62  ;;  %v1278_v24 = vld [vmem:[#allocation2 + $0xaa] sm:$0xff]  ;;  %v1279_v40 = vld [vmem:[#allocation2 + $0xb2] sm:$0xff] }
  0x42   : > { %1944 = vmatpush3.msra.mxu0 %v1384_v62  ;;  %1981 = vmatpush3.msra.mxu1 %v1384_v62  ;;  %v1270_v28 = vld [vmem:[#allocation2 + $0x4a] sm:$0xff] }
  0x43   : > { %832 = vrot.lane.b32.xlu1 %v2273_v29, %s2081_s10  ;;  %816 = vrot.lane.b32.xlu0 %v783_v30, %s2081_s10 }
  0x44   : > { %1945 = vmatprep.subr.mxu0 %v1383_v63  ;;  %1977 = vmatprep.subr.mxu1 %v1383_v63 }
  0x45   : > { %1946 = vmatpush3.msra.mxu0 %v1383_v63  ;;  %1982 = vmatpush3.msra.mxu1 %v1383_v63  ;;  %v1087_v63 = vld [vmem:[#allocation2 + $0xc8] sm:$0xff] }
  0x46   : > { %1947 = vmatprep.subr.mxu0 %v1382_v0  ;;  %1978 = vmatprep.subr.mxu1 %v1382_v0 }
  0x47   : > { %927 = vrot.lane.b32.xlu1 %v2343_v47, %s2082_s15  ;;  %911 = vrot.lane.b32.xlu0 %v879_v48, %s2082_s15 }
  0x48   : > { %1948 = vmatpush3.msra.mxu0 %v1382_v0  ;;  %1983 = vmatpush3.msra.mxu1 %v1382_v0 }
  0x49   : > { %1949 = vmatprep.subr.mxu0 %v1381_v1  ;;  %1979 = vmatprep.subr.mxu1 %v1381_v1 }
  0x4a   : > { %1950 = vmatpush3.msra.mxu0 %v1381_v1  ;;  %1984 = vmatpush3.msra.mxu1 %v1381_v1 }
  0x4b   : > { %640 = vrot.lane.b32.xlu1 %v2343_v47, %s2079_s7  ;;  %624 = vrot.lane.b32.xlu0 %v879_v48, %s2079_s7 }
  0x4f   : > { %929 = vrot.lane.b32.xlu1 %v2351_v49, %s2082_s15  ;;  %913 = vrot.lane.b32.xlu0 %v880_v50, %s2082_s15 }
  0x53   : > { %1024 = vrot.lane.b32.xlu1 %v2356_v51, %s2083_s17  ;;  %1008 = vrot.lane.b32.xlu0 %v976_v52, %s2083_s17 }
  0x57   : > { %642 = vrot.lane.b32.xlu1 %v2351_v49, %s2079_s7  ;;  %626 = vrot.lane.b32.xlu0 %v880_v50, %s2079_s7 }
  0x5b   : > { %737 = vrot.lane.b32.xlu1 %v2356_v51, %s2080_s21  ;;  %721 = vrot.lane.b32.xlu0 %v976_v52, %s2080_s21 }
  0x5f   : > { %1026 = vrot.lane.b32.xlu1 %v2367_v53, %s2083_s17  ;;  %1010 = vrot.lane.b32.xlu0 %v977_v54, %s2083_s17 }
  0x63   : > { %1122 = vrot.lane.b32.xlu1 %v2287_v33, %s2084_s19  ;;  %1106 = vrot.lane.b32.xlu0 %v2289_v34, %s2084_s19 }
  0x67   : > { %739 = vrot.lane.b32.xlu1 %v2367_v53, %s2080_s21  ;;  %723 = vrot.lane.b32.xlu0 %v977_v54, %s2080_s21 }
  0x6b   : > { %834 = vrot.lane.b32.xlu1 %v2287_v33, %s2081_s10  ;;  %818 = vrot.lane.b32.xlu0 %v2289_v34, %s2081_s10 }
  0x6f   : > { %1124 = vrot.lane.b32.xlu1 %v2291_v35, %s2084_s19  ;;  %1108 = vrot.lane.b32.xlu0 %v2293_v36, %s2084_s19 }
  0x73   : > { %1219 = vrot.lane.b32.xlu1 %v1179_v55, %s2085_s20  ;;  %1203 = vrot.lane.b32.xlu0 %v1171_v56, %s2085_s20 }
  0x77   : > { %836 = vrot.lane.b32.xlu1 %v2291_v35, %s2081_s10  ;;  %820 = vrot.lane.b32.xlu0 %v2293_v36, %s2081_s10 }
  0x7b   : > { %931 = vrot.lane.b32.xlu1 %v1179_v55, %s2082_s15  ;;  %915 = vrot.lane.b32.xlu0 %v1171_v56, %s2082_s15 }
  0x7f   : > { %1221 = vrot.lane.b32.xlu1 %v1180_v57, %s2085_s20  ;;  %1205 = vrot.lane.b32.xlu0 %v1172_v58, %s2085_s20 }
  0x83   : > { %1316 = vrot.lane.b32.xlu1 %v1276_v59, %s2086_s22  ;;  %1300 = vrot.lane.b32.xlu0 %v1268_v60, %s2086_s22 }
  0x87   : > { %644 = vrot.lane.b32.xlu1 %v1179_v55, %s2079_s7  ;;  %628 = vrot.lane.b32.xlu0 %v1171_v56, %s2079_s7  ;;  %v1086_v56 = vld [vmem:[#allocation2 + $0xc0] sm:$0xff] }
  0x8b   : > { %933 = vrot.lane.b32.xlu1 %v1180_v57, %s2082_s15  ;;  %917 = vrot.lane.b32.xlu0 %v1172_v58, %s2082_s15 }
  0x8f   : > { %1028 = vrot.lane.b32.xlu1 %v1276_v59, %s2083_s17  ;;  %1012 = vrot.lane.b32.xlu0 %v1268_v60, %s2083_s17 }
  0x93   : > { %1318 = vrot.lane.b32.xlu1 %v1277_v2, %s2086_s22  ;;  %1302 = vrot.lane.b32.xlu0 %v1269_v3, %s2086_s22 }
  0x97   : > { %646 = vrot.lane.b32.xlu1 %v1180_v57, %s2079_s7  ;;  %630 = vrot.lane.b32.xlu0 %v1172_v58, %s2079_s7 }
  0x9b   : > { %741 = vrot.lane.b32.xlu1 %v1276_v59, %s2080_s21  ;;  %725 = vrot.lane.b32.xlu0 %v1268_v60, %s2080_s21 }
  0x9f   : > { %1030 = vrot.lane.b32.xlu1 %v1277_v2, %s2083_s17  ;;  %1014 = vrot.lane.b32.xlu0 %v1269_v3, %s2083_s17 }
  0xa1   : > { %v623_v4 = vpop.permute.xlu1 %622  ;;  %v621_v5 = vpop.permute.xlu0 %620 }
  0xa2   : > { %670 = vst.msk [vmem:[#allocation3 + $0x8] sm:$0xff] %vm668_vm3, %v623_v4  ;;  %669 = vst.msk [vmem:[#allocation3] sm:$0xff] %vm668_vm3, %v621_v5 }
  0xa3   : > { %1126 = vrot.lane.b32.xlu1 %v2309_v41, %s2084_s19  ;;  %1110 = vrot.lane.b32.xlu0 %v2311_v42, %s2084_s19 }
  0xa5   : > { %v639_v6 = vpop.permute.xlu1 %638  ;;  %v637_v7 = vpop.permute.xlu0 %636 }
  0xa6   : > { %678 = vst.msk [vmem:[#allocation3 + $0x48] sm:$0xff] %vm668_vm3, %v639_v6  ;;  %677 = vst.msk [vmem:[#allocation3 + $0x40] sm:$0xff] %vm668_vm3, %v637_v7 }
  0xa7   : > { %743 = vrot.lane.b32.xlu1 %v1277_v2, %s2080_s21  ;;  %727 = vrot.lane.b32.xlu0 %v1269_v3, %s2080_s21  ;;  %v1183_v2 = vld [vmem:[#allocation2 + $0xc1] sm:$0xff] }
  0xa9   : > { %v734_v8 = vpop.permute.xlu1 %733  ;;  %v718_v9 = vpop.permute.xlu0 %717 }
  0xaa   : > { %774 = vst.msk [vmem:[#allocation3 + $0x40] sm:$0xff] %vm765_vm4, %v734_v8  ;;  %766 = vst.msk [vmem:[#allocation3] sm:$0xff] %vm765_vm4, %v718_v9  ;;  %v1184_v8 = vld [vmem:[#allocation2 + $0xc9] sm:$0xff] }
  0xab   : > { %838 = vrot.lane.b32.xlu1 %v2309_v41, %s2081_s10  ;;  %822 = vrot.lane.b32.xlu0 %v2311_v42, %s2081_s10  ;;  %v1271_v41 = vld [vmem:[#allocation2 + $0x52] sm:$0xff] }
  0xad   : > { %v736_v10 = vpop.permute.xlu1 %735  ;;  %v720_v11 = vpop.permute.xlu0 %719 }
  0xae   : > { %775 = vst.msk [vmem:[#allocation3 + $0x48] sm:$0xff] %vm765_vm4, %v736_v10  ;;  %767 = vst.msk [vmem:[#allocation3 + $0x8] sm:$0xff] %vm765_vm4, %v720_v11 }
  0xaf   : > { %1128 = vrot.lane.b32.xlu1 %v2318_v45, %s2084_s19  ;;  %1112 = vrot.lane.b32.xlu0 %v2331_v46, %s2084_s19 }
  0xb1   : > { %v831_v14 = vpop.permute.xlu1 %830  ;;  %v815_v15 = vpop.permute.xlu0 %814 }
  0xb2   : > { %871 = vst.msk [vmem:[#allocation3 + $0x40] sm:$0xff] %vm862_vm5, %v831_v14  ;;  %863 = vst.msk [vmem:[#allocation3] sm:$0xff] %vm862_vm5, %v815_v15 }
  0xb3   : > { %1223 = vrot.lane.b32.xlu1 %v1181_v12, %s2085_s20  ;;  %1207 = vrot.lane.b32.xlu0 %v1173_v13, %s2085_s20 }
  0xb5   : > { %v833_v16 = vpop.permute.xlu1 %832  ;;  %v817_v17 = vpop.permute.xlu0 %816 }
  0xb6   : > { %872 = vst.msk [vmem:[#allocation3 + $0x48] sm:$0xff] %vm862_vm5, %v833_v16  ;;  %864 = vst.msk [vmem:[#allocation3 + $0x8] sm:$0xff] %vm862_vm5, %v817_v17 }
  0xb7   : > { %840 = vrot.lane.b32.xlu1 %v2318_v45, %s2081_s10  ;;  %824 = vrot.lane.b32.xlu0 %v2331_v46, %s2081_s10 }
  0xb9   : > { %v928_v18 = vpop.permute.xlu1 %927  ;;  %v912_v19 = vpop.permute.xlu0 %911 }
  0xba   : > { %968 = vst.msk [vmem:[#allocation3 + $0x40] sm:$0xff] %vm959_vm6, %v928_v18  ;;  %960 = vst.msk [vmem:[#allocation3] sm:$0xff] %vm959_vm6, %v912_v19  ;;  %v1281_v18 = vld [vmem:[#allocation2 + $0xca] sm:$0xff] }
  0xbb   : > { %935 = vrot.lane.b32.xlu1 %v1181_v12, %s2082_s15  ;;  %919 = vrot.lane.b32.xlu0 %v1173_v13, %s2082_s15 }
  0xbd   : > { %v641_v22 = vpop.permute.xlu1 %640  ;;  %v625_v23 = vpop.permute.xlu0 %624 }
  0xbe   : > { %679 = vst.msk [vmem:[#allocation3 + $0x50] sm:$0xff] %vm668_vm3, %v641_v22  ;;  %671 = vst.msk [vmem:[#allocation3 + $0x10] sm:$0xff] %vm668_vm3, %v625_v23  ;;  %v1088_v23 = vld [vmem:[#allocation2 + $0xd8] sm:$0xff] }
  0xbf   : > { %1225 = vrot.lane.b32.xlu1 %v1182_v20, %s2085_s20  ;;  %1209 = vrot.lane.b32.xlu0 %v1174_v21, %s2085_s20 }
  0xc1   : > { %v930_v30 = vpop.permute.xlu1 %929  ;;  %v914_v32 = vpop.permute.xlu0 %913 }
  0xc2   : > { %969 = vst.msk [vmem:[#allocation3 + $0x48] sm:$0xff] %vm959_vm6, %v930_v30  ;;  %961 = vst.msk [vmem:[#allocation3 + $0x8] sm:$0xff] %vm959_vm6, %v914_v32  ;;  %v1089_v30 = vld [vmem:[#allocation2 + $0xe0] sm:$0xff] }
  0xc3   : > { %1320 = vrot.lane.b32.xlu1 %v1278_v24, %s2086_s22  ;;  %1304 = vrot.lane.b32.xlu0 %v1270_v28, %s2086_s22 }
  0xc5   : > { %v1025_v33 = vpop.permute.xlu1 %1024  ;;  %v1009_v34 = vpop.permute.xlu0 %1008 }
  0xc6   : > { %1065 = vst.msk [vmem:[#allocation3 + $0x40] sm:$0xff] %vm1056_vm7, %v1025_v33  ;;  %1057 = vst.msk [vmem:[#allocation3] sm:$0xff] %vm1056_vm7, %v1009_v34 }
  0xc7   : > { %648 = vrot.lane.b32.xlu1 %v1181_v12, %s2079_s7  ;;  %632 = vrot.lane.b32.xlu0 %v1173_v13, %s2079_s7 }
  0xc9   : > { %v643_v35 = vpop.permute.xlu1 %642  ;;  %v627_v36 = vpop.permute.xlu0 %626 }
  0xca   : > { %680 = vst.msk [vmem:[#allocation3 + $0x58] sm:$0xff] %vm668_vm3, %v643_v35  ;;  %672 = vst.msk [vmem:[#allocation3 + $0x18] sm:$0xff] %vm668_vm3, %v627_v36 }
  0xcb   : > { %937 = vrot.lane.b32.xlu1 %v1182_v20, %s2082_s15  ;;  %921 = vrot.lane.b32.xlu0 %v1174_v21, %s2082_s15 }
  0xcd   : > { %v738_v38 = vpop.permute.xlu1 %737  ;;  %v722_v39 = vpop.permute.xlu0 %721 }
  0xce   : > { %776 = vst.msk [vmem:[#allocation3 + $0x50] sm:$0xff] %vm765_vm4, %v738_v38  ;;  %768 = vst.msk [vmem:[#allocation3 + $0x10] sm:$0xff] %vm765_vm4, %v722_v39 }
  0xcf   : > { %1032 = vrot.lane.b32.xlu1 %v1278_v24, %s2083_s17  ;;  %1016 = vrot.lane.b32.xlu0 %v1270_v28, %s2083_s17 }
  0xd1   : > { %v1027_v42 = vpop.permute.xlu1 %1026  ;;  %v1011_v45 = vpop.permute.xlu0 %1010 }
  0xd2   : > { %1066 = vst.msk [vmem:[#allocation3 + $0x48] sm:$0xff] %vm1056_vm7, %v1027_v42  ;;  %1058 = vst.msk [vmem:[#allocation3 + $0x8] sm:$0xff] %vm1056_vm7, %v1011_v45 }
  0xd3   : > { %1322 = vrot.lane.b32.xlu1 %v1279_v40, %s2086_s22  ;;  %1306 = vrot.lane.b32.xlu0 %v1271_v41, %s2086_s22 }
  0xd5   : > { %v1123_v46 = vpop.permute.xlu1 %1122  ;;  %v1107_v48 = vpop.permute.xlu0 %1106 }
  0xd6   : > { %1163 = vst.msk [vmem:[#allocation3 + $0x40] sm:$0xff] %vm1154_vm8, %v1123_v46  ;;  %1155 = vst.msk [vmem:[#allocation3] sm:$0xff] %vm1154_vm8, %v1107_v48 }
  0xd7   : > { %650 = vrot.lane.b32.xlu1 %v1182_v20, %s2079_s7  ;;  %634 = vrot.lane.b32.xlu0 %v1174_v21, %s2079_s7 }
  0xd9   : > { %v740_v50 = vpop.permute.xlu1 %739  ;;  %v724_v52 = vpop.permute.xlu0 %723 }
  0xda   : > { %777 = vst.msk [vmem:[#allocation3 + $0x58] sm:$0xff] %vm765_vm4, %v740_v50  ;;  %769 = vst.msk [vmem:[#allocation3 + $0x18] sm:$0xff] %vm765_vm4, %v724_v52 }
  0xdb   : > { %745 = vrot.lane.b32.xlu1 %v1278_v24, %s2080_s21  ;;  %729 = vrot.lane.b32.xlu0 %v1270_v28, %s2080_s21 }
  0xdd   : > { %v835_v54 = vpop.permute.xlu1 %834  ;;  %v819_v55 = vpop.permute.xlu0 %818 }
  0xde   : > { %873 = vst.msk [vmem:[#allocation3 + $0x50] sm:$0xff] %vm862_vm5, %v835_v54  ;;  %865 = vst.msk [vmem:[#allocation3 + $0x10] sm:$0xff] %vm862_vm5, %v819_v55 }
  0xdf   : > { %1034 = vrot.lane.b32.xlu1 %v1279_v40, %s2083_s17  ;;  %1018 = vrot.lane.b32.xlu0 %v1271_v41, %s2083_s17 }
  0xe1   : > { %v1125_v57 = vpop.permute.xlu1 %1124  ;;  %v1109_v58 = vpop.permute.xlu0 %1108 }
  0xe2   : > { %1164 = vst.msk [vmem:[#allocation3 + $0x48] sm:$0xff] %vm1154_vm8, %v1125_v57  ;;  %1156 = vst.msk [vmem:[#allocation3 + $0x8] sm:$0xff] %vm1154_vm8, %v1109_v58 }
  0xe3   : > { %1130 = vrot.lane.b32.xlu1 %v1086_v56, %s2084_s19  ;;  %1114 = vrot.lane.b32.xlu0 %v2316_v44, %s2084_s19 }
  0xe5   : > { %v1220_v59 = vpop.permute.xlu1 %1219  ;;  %v1204_v60 = vpop.permute.xlu0 %1203 }
  0xe6   : > { %1260 = vst.msk [vmem:[#allocation3 + $0x40] sm:$0xff] %vm1251_vm9, %v1220_v59  ;;  %1252 = vst.msk [vmem:[#allocation3] sm:$0xff] %vm1251_vm9, %v1204_v60 }
  0xe7   : > { %747 = vrot.lane.b32.xlu1 %v1279_v40, %s2080_s21  ;;  %731 = vrot.lane.b32.xlu0 %v1271_v41, %s2080_s21 }
  0xe9   : > { %v837_v61 = vpop.permute.xlu1 %836  ;;  %v821_v62 = vpop.permute.xlu0 %820 }
  0xea   : > { %874 = vst.msk [vmem:[#allocation3 + $0x58] sm:$0xff] %vm862_vm5, %v837_v61  ;;  %866 = vst.msk [vmem:[#allocation3 + $0x18] sm:$0xff] %vm862_vm5, %v821_v62 }
  0xeb   : > { %842 = vrot.lane.b32.xlu1 %v1086_v56, %s2081_s10  ;;  %826 = vrot.lane.b32.xlu0 %v2316_v44, %s2081_s10 }
  0xed   : > { %v932_v0 = vpop.permute.xlu1 %931  ;;  %v916_v1 = vpop.permute.xlu0 %915 }
  0xee   : > { %970 = vst.msk [vmem:[#allocation3 + $0x50] sm:$0xff] %vm959_vm6, %v932_v0  ;;  %962 = vst.msk [vmem:[#allocation3 + $0x10] sm:$0xff] %vm959_vm6, %v916_v1 }
  0xef   : > { %1132 = vrot.lane.b32.xlu1 %v1087_v63, %s2084_s19  ;;  %1116 = vrot.lane.b32.xlu0 %v2314_v43, %s2084_s19 }
  0xf1   : > { %v1222_v3 = vpop.permute.xlu1 %1221  ;;  %v1206_v4 = vpop.permute.xlu0 %1205 }
  0xf2   : > { %1261 = vst.msk [vmem:[#allocation3 + $0x48] sm:$0xff] %vm1251_vm9, %v1222_v3  ;;  %1253 = vst.msk [vmem:[#allocation3 + $0x8] sm:$0xff] %vm1251_vm9, %v1206_v4 }
  0xf3   : > { %1227 = vrot.lane.b32.xlu1 %v1183_v2, %s2085_s20  ;;  %1211 = vrot.lane.b32.xlu0 %v2269_v26, %s2085_s20 }
  0xf5   : > { %v1317_v44 = vpop.permute.xlu1 %1316  ;;  %v1301_v5 = vpop.permute.xlu0 %1300 }
  0xf6   : > { %1357 = vst.msk [vmem:[#allocation3 + $0x40] sm:$0xff] %vm1348_vm10, %v1317_v44  ;;  %1349 = vst.msk [vmem:[#allocation3] sm:$0xff] %vm1348_vm10, %v1301_v5 }
  0xf7   : > { %844 = vrot.lane.b32.xlu1 %v1087_v63, %s2081_s10  ;;  %828 = vrot.lane.b32.xlu0 %v2314_v43, %s2081_s10 }
  0xf9   : > { %v645_v6 = vpop.permute.xlu1 %644  ;;  %v629_v7 = vpop.permute.xlu0 %628 }
  0xfa   : > { %681 = vst.msk [vmem:[#allocation3 + $0x60] sm:$0xff] %vm668_vm3, %v645_v6  ;;  %673 = vst.msk [vmem:[#allocation3 + $0x20] sm:$0xff] %vm668_vm3, %v629_v7 }
  0xfb   : > { %939 = vrot.lane.b32.xlu1 %v1183_v2, %s2082_s15  ;;  %923 = vrot.lane.b32.xlu0 %v2269_v26, %s2082_s15  ;;  %v1280_v26 = vld [vmem:[#allocation2 + $0xc2] sm:$0xff] }
  0xfd   : > { %v934_v9 = vpop.permute.xlu1 %933  ;;  %v918_v10 = vpop.permute.xlu0 %917  ;;  %v1365_v11 = vld [vmem:[#allocation3] sm:$0xff] }
  0xfe   : > { %v1373_v12 = vld [vmem:[#allocation3 + $0x40] sm:$0xff]  ;;  %971 = vst.msk [vmem:[#allocation3 + $0x58] sm:$0xff] %vm959_vm6, %v934_v9  ;;  %963 = vst.msk [vmem:[#allocation3 + $0x18] sm:$0xff] %vm959_vm6, %v918_v10  ;;  %1951 = vmatprep.mubr.msk.f32.mxu0 %vm1386_vm11, %v1365_v11 }
  0xff   : > { %1963 = vmatprep.mubr.msk.f32.mxu1 %vm1386_vm11, %v1373_v12  ;;  %1229 = vrot.lane.b32.xlu1 %v1184_v8, %s2085_s20 }
 0x100   : > { %1213 = vrot.lane.b32.xlu0 %v2267_v25, %s2085_s20 }
 0x101   : > { %v1029_v43 = vpop.permute.xlu1 %1028  ;;  %v1013_v13 = vpop.permute.xlu0 %1012 }
 0x102   : > { %1067 = vst.msk [vmem:[#allocation3 + $0x50] sm:$0xff] %vm1056_vm7, %v1029_v43  ;;  %1059 = vst.msk [vmem:[#allocation3 + $0x10] sm:$0xff] %vm1056_vm7, %v1013_v13 }
 0x103   : > { %1324 = vrot.lane.b32.xlu1 %v1280_v26, %s2086_s22 }
 0x104   : > { %1308 = vrot.lane.b32.xlu0 %v2285_v31, %s2086_s22 }
 0x105   : > { %v1319_v14 = vpop.permute.xlu1 %1318  ;;  %v1303_v15 = vpop.permute.xlu0 %1302 }
 0x106   : > { %1358 = vst.msk [vmem:[#allocation3 + $0x48] sm:$0xff] %vm1348_vm10, %v1319_v14  ;;  %1350 = vst.msk [vmem:[#allocation3 + $0x8] sm:$0xff] %vm1348_vm10, %v1303_v15 }
 0x107   : > { %941 = vrot.lane.b32.xlu1 %v1184_v8, %s2082_s15 }
 0x108   : > { %925 = vrot.lane.b32.xlu0 %v2267_v25, %s2082_s15 }
 0x109   : > { %v647_v16 = vpop.permute.xlu1 %646  ;;  %v631_v17 = vpop.permute.xlu0 %630 }
 0x10a   : > { %682 = vst.msk [vmem:[#allocation3 + $0x68] sm:$0xff] %vm668_vm3, %v647_v16  ;;  %674 = vst.msk [vmem:[#allocation3 + $0x28] sm:$0xff] %vm668_vm3, %v631_v17 }
 0x10b   : > { %1036 = vrot.lane.b32.xlu1 %v1280_v26, %s2083_s17 }
 0x10c   : > { %1020 = vrot.lane.b32.xlu0 %v2285_v31, %s2083_s17 }
 0x10d   : > { %v742_v19 = vpop.permute.xlu1 %741  ;;  %v726_v20 = vpop.permute.xlu0 %725  ;;  %v1366_v21 = vld [vmem:[#allocation3 + $0x8] sm:$0xff] }
 0x10e   : > { %v1374_v22 = vld [vmem:[#allocation3 + $0x48] sm:$0xff]  ;;  %778 = vst.msk [vmem:[#allocation3 + $0x60] sm:$0xff] %vm765_vm4, %v742_v19  ;;  %770 = vst.msk [vmem:[#allocation3 + $0x20] sm:$0xff] %vm765_vm4, %v726_v20  ;;  %1952 = vmatmul.mubr.msk.f32.vlgmr.msra.gmra.mxu0 %vm1386_vm11, %v1366_v21 }
 0x10f   : > { %1964 = vmatmul.mubr.msk.f32.vlgmr.msra.gmra.mxu1 %vm1386_vm11, %v1374_v22  ;;  %1326 = vrot.lane.b32.xlu1 %v1281_v18, %s2086_s22 }
 0x110   : > { %1310 = vrot.lane.b32.xlu0 %v2306_v37, %s2086_s22 }
 0x111   : > { %v1031_v25 = vpop.permute.xlu1 %1030  ;;  %v1015_v31 = vpop.permute.xlu0 %1014 }
 0x112   : > { %1068 = vst.msk [vmem:[#allocation3 + $0x58] sm:$0xff] %vm1056_vm7, %v1031_v25  ;;  %1060 = vst.msk [vmem:[#allocation3 + $0x18] sm:$0xff] %vm1056_vm7, %v1015_v31 }
 0x113   : > { %1038 = vrot.lane.b32.xlu1 %v1281_v18, %s2083_s17 }
 0x114   : > { %1022 = vrot.lane.b32.xlu0 %v2306_v37, %s2083_s17  ;;  %v1185_v37 = vld [vmem:[#allocation2 + $0xd9] sm:$0xff] }
 0x115   : > { %v1127_v24 = vpop.permute.xlu1 %1126  ;;  %v1111_v28 = vpop.permute.xlu0 %1110 }
 0x116   : > { %1165 = vst.msk [vmem:[#allocation3 + $0x50] sm:$0xff] %vm1154_vm8, %v1127_v24  ;;  %1157 = vst.msk [vmem:[#allocation3 + $0x10] sm:$0xff] %vm1154_vm8, %v1111_v28 }
 0x117   : > { %1134 = vrot.lane.b32.xlu1 %v1088_v23, %s2084_s19 }
 0x118   : > { %1118 = vrot.lane.b32.xlu0 %v2271_v27, %s2084_s19  ;;  %v1186_v27 = vld [vmem:[#allocation2 + $0xe1] sm:$0xff] }
 0x119   : > { %v744_v32 = vpop.permute.xlu1 %743  ;;  %v728_v33 = vpop.permute.xlu0 %727 }
 0x11a   : > { %779 = vst.msk [vmem:[#allocation3 + $0x68] sm:$0xff] %vm765_vm4, %v744_v32  ;;  %771 = vst.msk [vmem:[#allocation3 + $0x28] sm:$0xff] %vm765_vm4, %v728_v33 }
 0x11b   : > { %1136 = vrot.lane.b32.xlu1 %v1089_v30, %s2084_s19 }
 0x11c   : > { %1120 = vrot.lane.b32.xlu0 %v2273_v29, %s2084_s19  ;;  %v1282_v29 = vld [vmem:[#allocation2 + $0xda] sm:$0xff] }
 0x11d   : > { %v839_v34 = vpop.permute.xlu1 %838  ;;  %v823_v35 = vpop.permute.xlu0 %822 }
 0x11e   : > { %875 = vst.msk [vmem:[#allocation3 + $0x60] sm:$0xff] %vm862_vm5, %v839_v34  ;;  %867 = vst.msk [vmem:[#allocation3 + $0x20] sm:$0xff] %vm862_vm5, %v823_v35 }
 0x11f   : > { %1231 = vrot.lane.b32.xlu1 %v1185_v37, %s2085_s20 }
 0x120   : > { %1215 = vrot.lane.b32.xlu0 %v2343_v47, %s2085_s20  ;;  %v1283_v47 = vld [vmem:[#allocation2 + $0xe2] sm:$0xff] }
 0x121   : > { %v1129_v36 = vpop.permute.xlu1 %1128  ;;  %v1113_v38 = vpop.permute.xlu0 %1112 }
 0x122   : > { %1166 = vst.msk [vmem:[#allocation3 + $0x58] sm:$0xff] %vm1154_vm8, %v1129_v36  ;;  %1158 = vst.msk [vmem:[#allocation3 + $0x18] sm:$0xff] %vm1154_vm8, %v1113_v38 }
 0x123   : > { %1233 = vrot.lane.b32.xlu1 %v1186_v27, %s2085_s20 }
 0x124   : > { %1217 = vrot.lane.b32.xlu0 %v2351_v49, %s2085_s20 }
 0x125   : > { %v1224_v39 = vpop.permute.xlu1 %1223  ;;  %v1208_v40 = vpop.permute.xlu0 %1207 }
 0x126   : > { %1262 = vst.msk [vmem:[#allocation3 + $0x50] sm:$0xff] %vm1251_vm9, %v1224_v39  ;;  %1254 = vst.msk [vmem:[#allocation3 + $0x10] sm:$0xff] %vm1251_vm9, %v1208_v40 }
 0x127   : > { %1328 = vrot.lane.b32.xlu1 %v1282_v29, %s2086_s22 }
 0x128   : > { %1312 = vrot.lane.b32.xlu0 %v2356_v51, %s2086_s22 }
 0x129   : > { %v841_v41 = vpop.permute.xlu1 %840  ;;  %v825_v42 = vpop.permute.xlu0 %824 }
 0x12a   : > { %876 = vst.msk [vmem:[#allocation3 + $0x68] sm:$0xff] %vm862_vm5, %v841_v41  ;;  %868 = vst.msk [vmem:[#allocation3 + $0x28] sm:$0xff] %vm862_vm5, %v825_v42 }
 0x12b   : > { %1330 = vrot.lane.b32.xlu1 %v1283_v47, %s2086_s22 }
 0x12c   : > { %1314 = vrot.lane.b32.xlu0 %v2367_v53, %s2086_s22 }
 0x12d   : > { %v936_v49 = vpop.permute.xlu1 %935  ;;  %v920_v45 = vpop.permute.xlu0 %919 }
 0x12e   : > { %972 = vst.msk [vmem:[#allocation3 + $0x60] sm:$0xff] %vm959_vm6, %v936_v49  ;;  %964 = vst.msk [vmem:[#allocation3 + $0x20] sm:$0xff] %vm959_vm6, %v920_v45 }
 0x131   : > { %v1226_v46 = vpop.permute.xlu1 %1225  ;;  %v1210_v51 = vpop.permute.xlu0 %1209 }
 0x132   : > { %1263 = vst.msk [vmem:[#allocation3 + $0x58] sm:$0xff] %vm1251_vm9, %v1226_v46  ;;  %1255 = vst.msk [vmem:[#allocation3 + $0x18] sm:$0xff] %vm1251_vm9, %v1210_v51 }
 0x135   : > { %v1321_v48 = vpop.permute.xlu1 %1320  ;;  %v1305_v50 = vpop.permute.xlu0 %1304 }
 0x136   : > { %1359 = vst.msk [vmem:[#allocation3 + $0x50] sm:$0xff] %vm1348_vm10, %v1321_v48  ;;  %1351 = vst.msk [vmem:[#allocation3 + $0x10] sm:$0xff] %vm1348_vm10, %v1305_v50 }
 0x139   : > { %v649_v52 = vpop.permute.xlu1 %648  ;;  %v633_v53 = vpop.permute.xlu0 %632 }
 0x13a   : > { %683 = vst.msk [vmem:[#allocation3 + $0x70] sm:$0xff] %vm668_vm3, %v649_v52  ;;  %675 = vst.msk [vmem:[#allocation3 + $0x30] sm:$0xff] %vm668_vm3, %v633_v53  ;;  %v2671_v52 = vld [vmem:[%s2761_s4] ss:$0 sm:$0xff] }
 0x13d   : > { %v938_v54 = vpop.permute.xlu1 %937  ;;  %v922_v55 = vpop.permute.xlu0 %921  ;;  %v1367_v56 = vld [vmem:[#allocation3 + $0x10] sm:$0xff] }
 0x13e   : > { %v1375_v57 = vld [vmem:[#allocation3 + $0x50] sm:$0xff]  ;;  %973 = vst.msk [vmem:[#allocation3 + $0x68] sm:$0xff] %vm959_vm6, %v938_v54  ;;  %965 = vst.msk [vmem:[#allocation3 + $0x28] sm:$0xff] %vm959_vm6, %v922_v55  ;;  %1954 = vmatprep.mubr.msk.f32.mxu0 %vm1386_vm11, %v1367_v56 }
 0x13f   : > { %1966 = vmatprep.mubr.msk.f32.mxu1 %vm1386_vm11, %v1375_v57  ;;  %v2676_v54 = vld [vmem:[%s2762_s5] ss:$0 sm:$0xff] }
 0x141   : > { %v1033_v58 = vpop.permute.xlu1 %1032  ;;  %v1017_v59 = vpop.permute.xlu0 %1016 }
 0x142   : > { %1069 = vst.msk [vmem:[#allocation3 + $0x60] sm:$0xff] %vm1056_vm7, %v1033_v58  ;;  %1061 = vst.msk [vmem:[#allocation3 + $0x20] sm:$0xff] %vm1056_vm7, %v1017_v59 }
 0x145   : > { %v1323_v60 = vpop.permute.xlu1 %1322  ;;  %v1307_v61 = vpop.permute.xlu0 %1306 }
 0x146   : > { %1360 = vst.msk [vmem:[#allocation3 + $0x58] sm:$0xff] %vm1348_vm10, %v1323_v60  ;;  %1352 = vst.msk [vmem:[#allocation3 + $0x18] sm:$0xff] %vm1348_vm10, %v1307_v61 }
 0x149   : > { %v651_v62 = vpop.permute.xlu1 %650  ;;  %v635_v63 = vpop.permute.xlu0 %634 }
 0x14a   : > { %684 = vst.msk [vmem:[#allocation3 + $0x78] sm:$0xff] %vm668_vm3, %v651_v62  ;;  %676 = vst.msk [vmem:[#allocation3 + $0x38] sm:$0xff] %vm668_vm3, %v635_v63 }
 0x14d   : > { %v746_v0 = vpop.permute.xlu1 %745  ;;  %v730_v1 = vpop.permute.xlu0 %729  ;;  %v1368_v2 = vld [vmem:[#allocation3 + $0x18] sm:$0xff] }
 0x14e   : > { %v1376_v3 = vld [vmem:[#allocation3 + $0x58] sm:$0xff]  ;;  %780 = vst.msk [vmem:[#allocation3 + $0x70] sm:$0xff] %vm765_vm4, %v746_v0  ;;  %772 = vst.msk [vmem:[#allocation3 + $0x30] sm:$0xff] %vm765_vm4, %v730_v1  ;;  %1955 = vmatmul.mubr.msk.f32.gmra.mxu0 %vm1386_vm11, %v1368_v2 }
 0x14f   : > { %1967 = vmatmul.mubr.msk.f32.gmra.mxu1 %vm1386_vm11, %v1376_v3 }
 0x151   : > { %v1035_v4 = vpop.permute.xlu1 %1034  ;;  %v1019_v44 = vpop.permute.xlu0 %1018 }
 0x152   : > { %1070 = vst.msk [vmem:[#allocation3 + $0x68] sm:$0xff] %vm1056_vm7, %v1035_v4  ;;  %1062 = vst.msk [vmem:[#allocation3 + $0x28] sm:$0xff] %vm1056_vm7, %v1019_v44 }
 0x155   : > { %v1131_v5 = vpop.permute.xlu1 %1130  ;;  %v1115_v6 = vpop.permute.xlu0 %1114 }
 0x156   : > { %1167 = vst.msk [vmem:[#allocation3 + $0x60] sm:$0xff] %vm1154_vm8, %v1131_v5  ;;  %1159 = vst.msk [vmem:[#allocation3 + $0x20] sm:$0xff] %vm1154_vm8, %v1115_v6 }
 0x159   : > { %v748_v7 = vpop.permute.xlu1 %747  ;;  %v732_v8 = vpop.permute.xlu0 %731 }
 0x15a   : > { %781 = vst.msk [vmem:[#allocation3 + $0x78] sm:$0xff] %vm765_vm4, %v748_v7  ;;  %773 = vst.msk [vmem:[#allocation3 + $0x38] sm:$0xff] %vm765_vm4, %v732_v8 }
 0x15d   : > { %v843_v9 = vpop.permute.xlu1 %842  ;;  %v827_v10 = vpop.permute.xlu0 %826 }
 0x15e   : > { %877 = vst.msk [vmem:[#allocation3 + $0x70] sm:$0xff] %vm862_vm5, %v843_v9  ;;  %869 = vst.msk [vmem:[#allocation3 + $0x30] sm:$0xff] %vm862_vm5, %v827_v10 }
 0x161   : > { %v1133_v11 = vpop.permute.xlu1 %1132  ;;  %v1117_v12 = vpop.permute.xlu0 %1116 }
 0x162   : > { %1168 = vst.msk [vmem:[#allocation3 + $0x68] sm:$0xff] %vm1154_vm8, %v1133_v11  ;;  %1160 = vst.msk [vmem:[#allocation3 + $0x28] sm:$0xff] %vm1154_vm8, %v1117_v12 }
 0x165   : > { %v1228_v26 = vpop.permute.xlu1 %1227  ;;  %v1212_v43 = vpop.permute.xlu0 %1211 }
 0x166   : > { %1264 = vst.msk [vmem:[#allocation3 + $0x60] sm:$0xff] %vm1251_vm9, %v1228_v26  ;;  %1256 = vst.msk [vmem:[#allocation3 + $0x20] sm:$0xff] %vm1251_vm9, %v1212_v43 }
 0x169   : > { %v845_v13 = vpop.permute.xlu1 %844  ;;  %v829_v14 = vpop.permute.xlu0 %828 }
 0x16a   : > { %878 = vst.msk [vmem:[#allocation3 + $0x78] sm:$0xff] %vm862_vm5, %v845_v13  ;;  %870 = vst.msk [vmem:[#allocation3 + $0x38] sm:$0xff] %vm862_vm5, %v829_v14 }
 0x16d   : > { %v940_v15 = vpop.permute.xlu1 %939  ;;  %v924_v16 = vpop.permute.xlu0 %923 }
 0x16e   : > { %974 = vst.msk [vmem:[#allocation3 + $0x70] sm:$0xff] %vm959_vm6, %v940_v15  ;;  %966 = vst.msk [vmem:[#allocation3 + $0x30] sm:$0xff] %vm959_vm6, %v924_v16 }
 0x171   : > { %v1230_v17 = vpop.permute.xlu1 %1229 }
 0x172   : > { %v1214_v18 = vpop.permute.xlu0 %1213  ;;  %1265 = vst.msk [vmem:[#allocation3 + $0x68] sm:$0xff] %vm1251_vm9, %v1230_v17 }
 0x173   : > { %1257 = vst.msk [vmem:[#allocation3 + $0x28] sm:$0xff] %vm1251_vm9, %v1214_v18 }
 0x175   : > { %v1325_v19 = vpop.permute.xlu1 %1324 }
 0x176   : > { %v1309_v20 = vpop.permute.xlu0 %1308  ;;  %1361 = vst.msk [vmem:[#allocation3 + $0x60] sm:$0xff] %vm1348_vm10, %v1325_v19 }
 0x177   : > { %1353 = vst.msk [vmem:[#allocation3 + $0x20] sm:$0xff] %vm1348_vm10, %v1309_v20 }
 0x179   : > { %v942_v21 = vpop.permute.xlu1 %941 }
 0x17a   : > { %v926_v22 = vpop.permute.xlu0 %925  ;;  %975 = vst.msk [vmem:[#allocation3 + $0x78] sm:$0xff] %vm959_vm6, %v942_v21 }
 0x17b   : > { %967 = vst.msk [vmem:[#allocation3 + $0x38] sm:$0xff] %vm959_vm6, %v926_v22 }
 0x17d   : > { %v1037_v25 = vpop.permute.xlu1 %1036  ;;  %v1377_v24 = vld [vmem:[#allocation3 + $0x60] sm:$0xff] }
 0x17e   : > { %v1021_v31 = vpop.permute.xlu0 %1020  ;;  %v1369_v23 = vld [vmem:[#allocation3 + $0x20] sm:$0xff]  ;;  %1071 = vst.msk [vmem:[#allocation3 + $0x70] sm:$0xff] %vm1056_vm7, %v1037_v25  ;;  %1969 = vmatprep.mubr.msk.f32.mxu1 %vm1386_vm11, %v1377_v24 }
 0x17f   : > { %1063 = vst.msk [vmem:[#allocation3 + $0x30] sm:$0xff] %vm1056_vm7, %v1021_v31  ;;  %1957 = vmatprep.mubr.msk.f32.mxu0 %vm1386_vm11, %v1369_v23 }
 0x181   : > { %v1327_v28 = vpop.permute.xlu1 %1326 }
 0x182   : > { %v1311_v30 = vpop.permute.xlu0 %1310  ;;  %1362 = vst.msk [vmem:[#allocation3 + $0x68] sm:$0xff] %vm1348_vm10, %v1327_v28 }
 0x183   : > { %1354 = vst.msk [vmem:[#allocation3 + $0x28] sm:$0xff] %vm1348_vm10, %v1311_v30 }
 0x185   : > { %v1039_v32 = vpop.permute.xlu1 %1038 }
 0x186   : > { %v1023_v33 = vpop.permute.xlu0 %1022  ;;  %1072 = vst.msk [vmem:[#allocation3 + $0x78] sm:$0xff] %vm1056_vm7, %v1039_v32 }
 0x187   : > { %1064 = vst.msk [vmem:[#allocation3 + $0x38] sm:$0xff] %vm1056_vm7, %v1023_v33 }
 0x189   : > { %v1135_v37 = vpop.permute.xlu1 %1134  ;;  %v1378_v27 = vld [vmem:[#allocation3 + $0x68] sm:$0xff] }
 0x18a   : > { %v1119_v34 = vpop.permute.xlu0 %1118  ;;  %v1370_v35 = vld [vmem:[#allocation3 + $0x28] sm:$0xff]  ;;  %1169 = vst.msk [vmem:[#allocation3 + $0x70] sm:$0xff] %vm1154_vm8, %v1135_v37  ;;  %1970 = vmatmul.mubr.msk.f32.gmra.mxu1 %vm1386_vm11, %v1378_v27 }
 0x18b   : > { %1161 = vst.msk [vmem:[#allocation3 + $0x30] sm:$0xff] %vm1154_vm8, %v1119_v34  ;;  %1958 = vmatmul.mubr.msk.f32.gmra.mxu0 %vm1386_vm11, %v1370_v35 }
 0x18d   : > { %v1137_v36 = vpop.permute.xlu1 %1136 }
 0x18e   : > { %v1121_v38 = vpop.permute.xlu0 %1120  ;;  %1170 = vst.msk [vmem:[#allocation3 + $0x78] sm:$0xff] %vm1154_vm8, %v1137_v36 }
 0x18f   : > { %1162 = vst.msk [vmem:[#allocation3 + $0x38] sm:$0xff] %vm1154_vm8, %v1121_v38 }
 0x191   : > { %v1232_v29 = vpop.permute.xlu1 %1231 }
 0x192   : > { %v1216_v39 = vpop.permute.xlu0 %1215  ;;  %1266 = vst.msk [vmem:[#allocation3 + $0x70] sm:$0xff] %vm1251_vm9, %v1232_v29 }
 0x193   : > { %1258 = vst.msk [vmem:[#allocation3 + $0x30] sm:$0xff] %vm1251_vm9, %v1216_v39 }
 0x195   : > { %v1234_v40 = vpop.permute.xlu1 %1233 }
 0x196   : > { %v1218_v47 = vpop.permute.xlu0 %1217  ;;  %1267 = vst.msk [vmem:[#allocation3 + $0x78] sm:$0xff] %vm1251_vm9, %v1234_v40 }
 0x197   : > { %1259 = vst.msk [vmem:[#allocation3 + $0x38] sm:$0xff] %vm1251_vm9, %v1218_v47 }
 0x199   : > { %v1329_v41 = vpop.permute.xlu1 %1328 }
 0x19a   : > { %v1313_v42 = vpop.permute.xlu0 %1312  ;;  %1363 = vst.msk [vmem:[#allocation3 + $0x70] sm:$0xff] %vm1348_vm10, %v1329_v41 }
 0x19b   : > { %1355 = vst.msk [vmem:[#allocation3 + $0x30] sm:$0xff] %vm1348_vm10, %v1313_v42 }
 0x19d   : > { %v1331_v49 = vpop.permute.xlu1 %1330 }
 0x19e   : > { %v1315_v45 = vpop.permute.xlu0 %1314  ;;  %1364 = vst.msk [vmem:[#allocation3 + $0x78] sm:$0xff] %vm1348_vm10, %v1331_v49 }
 0x19f   : > { %1356 = vst.msk [vmem:[#allocation3 + $0x38] sm:$0xff] %vm1348_vm10, %v1315_v45 }
 0x1a1   : > { %v1379_v51 = vld [vmem:[#allocation3 + $0x70] sm:$0xff] }
 0x1a2   : > { %v1371_v46 = vld [vmem:[#allocation3 + $0x30] sm:$0xff]  ;;  %1972 = vmatprep.mubr.msk.f32.mxu1 %vm1386_vm11, %v1379_v51 }
 0x1a3   : > { %1960 = vmatprep.mubr.msk.f32.mxu0 %vm1386_vm11, %v1371_v46 }
 0x1a5   : > { %v1380_v50 = vld [vmem:[#allocation3 + $0x78] sm:$0xff] }
 0x1a6   : > { %v1372_v48 = vld [vmem:[#allocation3 + $0x38] sm:$0xff]  ;;  %1973 = vmatmul.mubr.msk.f32.gmra.mxu1 %vm1386_vm11, %v1380_v50 }
 0x1a7   : > { %1961 = vmatmul.mubr.msk.f32.gmra.mxu0 %vm1386_vm11, %v1372_v48 }
 0x1ce   : > { %v1953_v53 = vpop.f32.mrf.mxu0 }
 0x1cf   : > { %v1965_v55 = vpop.f32.mrf.mxu1  ;;  %v1592_v56 = vmul.f32 %v1953_v53, %v2671_v52 }
 0x1d0   : > { %v1600_v57 = vmul.f32 %v1965_v55, %v2671_v52  ;;  %v1505_v58 = vpop.f32.mrf.mxu0 }
 0x1d1   : > { %v1545_v59 = vpop.f32.mrf.mxu1  ;;  %v1615_v60 = vadd.f32 %v2676_v54, %v1592_v56  ;;  %v1591_v62 = vmul.f32 %v2671_v52, %v1505_v58 }
 0x1d2   : > { %v1623_v61 = vadd.f32 %v2676_v54, %v1600_v57  ;;  %v1599_v63 = vmul.f32 %v2671_v52, %v1545_v59 }
 0x1d3   : > { %v1631_v0 = vmax.f32 %v1615_v60, 0.0  ;;  %v1614_v2 = vadd.f32 %v2676_v54, %v1591_v62 }
 0x1d4   : > { %v1639_v1 = vmax.f32 %v1623_v61, 0.0  ;;  %v1622_v3 = vadd.f32 %v2676_v54, %v1599_v63 }
 0x1d5   : > { %1648 = vst.msk [vmem:[%s2206_s18 + $0x8] sm:$0xff] %vm1646_vm12, %v1631_v0  ;;  %v1630_v4 = vmax.f32 %v1614_v2, 0.0 }
 0x1d6   : > { %1656 = vst.msk [vmem:[%s2206_s18 + $0x48] sm:$0xff] %vm1646_vm12, %v1639_v1  ;;  %v1638_v44 = vmax.f32 %v1622_v3, 0.0 }
 0x1d7   : > { %1647 = vst.msk [vmem:[%s2206_s18] sm:$0xff] %vm1646_vm12, %v1630_v4 }
 0x1d8   : > { %1655 = vst.msk [vmem:[%s2206_s18 + $0x40] sm:$0xff] %vm1646_vm12, %v1638_v44 }
 0x20e   : > { %v1956_v5 = vpop.f32.mrf.mxu0 }
 0x20f   : > { %v1968_v6 = vpop.f32.mrf.mxu1  ;;  %v1594_v7 = vmul.f32 %v1956_v5, %v2671_v52 }
 0x210   : > { %v1602_v8 = vmul.f32 %v1968_v6, %v2671_v52  ;;  %v1515_v9 = vpop.f32.mrf.mxu0 }
 0x211   : > { %v1555_v10 = vpop.f32.mrf.mxu1  ;;  %v1617_v11 = vadd.f32 %v2676_v54, %v1594_v7  ;;  %v1593_v26 = vmul.f32 %v2671_v52, %v1515_v9 }
 0x212   : > { %v1625_v12 = vadd.f32 %v2676_v54, %v1602_v8  ;;  %v1601_v43 = vmul.f32 %v2671_v52, %v1555_v10 }
 0x213   : > { %v1633_v13 = vmax.f32 %v1617_v11, 0.0  ;;  %v1616_v15 = vadd.f32 %v2676_v54, %v1593_v26 }
 0x214   : > { %v1641_v14 = vmax.f32 %v1625_v12, 0.0  ;;  %v1624_v16 = vadd.f32 %v2676_v54, %v1601_v43 }
 0x215   : > { %1650 = vst.msk [vmem:[%s2206_s18 + $0x18] sm:$0xff] %vm1646_vm12, %v1633_v13  ;;  %v1632_v17 = vmax.f32 %v1616_v15, 0.0 }
 0x216   : > { %1658 = vst.msk [vmem:[%s2206_s18 + $0x58] sm:$0xff] %vm1646_vm12, %v1641_v14  ;;  %v1640_v18 = vmax.f32 %v1624_v16, 0.0 }
 0x217   : > { %1649 = vst.msk [vmem:[%s2206_s18 + $0x10] sm:$0xff] %vm1646_vm12, %v1632_v17 }
 0x218   : > { %1657 = vst.msk [vmem:[%s2206_s18 + $0x50] sm:$0xff] %vm1646_vm12, %v1640_v18 }
 0x24a   : > { %v1971_v20 = vpop.f32.mrf.mxu1 }
 0x24b   : > { %v1959_v19 = vpop.f32.mrf.mxu0  ;;  %v1604_v22 = vmul.f32 %v1971_v20, %v2671_v52 }
 0x24c   : > { %v1596_v21 = vmul.f32 %v1959_v19, %v2671_v52  ;;  %v1565_v31 = vpop.f32.mrf.mxu1 }
 0x24d   : > { %v1525_v25 = vpop.f32.mrf.mxu0  ;;  %v1627_v24 = vadd.f32 %v2676_v54, %v1604_v22  ;;  %v1603_v30 = vmul.f32 %v2671_v52, %v1565_v31 }
 0x24e   : > { %v1619_v23 = vadd.f32 %v2676_v54, %v1596_v21  ;;  %v1595_v28 = vmul.f32 %v2671_v52, %v1525_v25 }
 0x24f   : > { %v1643_v33 = vmax.f32 %v1627_v24, 0.0  ;;  %v1626_v34 = vadd.f32 %v2676_v54, %v1603_v30 }
 0x250   : > { %v1635_v32 = vmax.f32 %v1619_v23, 0.0  ;;  %v1618_v37 = vadd.f32 %v2676_v54, %v1595_v28 }
 0x251   : > { %1660 = vst.msk [vmem:[%s2206_s18 + $0x68] sm:$0xff] %vm1646_vm12, %v1643_v33  ;;  %v1642_v27 = vmax.f32 %v1626_v34, 0.0 }
 0x252   : > { %1652 = vst.msk [vmem:[%s2206_s18 + $0x28] sm:$0xff] %vm1646_vm12, %v1635_v32  ;;  %v1634_v35 = vmax.f32 %v1618_v37, 0.0 }
 0x253   : > { %1659 = vst.msk [vmem:[%s2206_s18 + $0x60] sm:$0xff] %vm1646_vm12, %v1642_v27 }
 0x254   : > { %1651 = vst.msk [vmem:[%s2206_s18 + $0x20] sm:$0xff] %vm1646_vm12, %v1634_v35 }
 0x266   : > { %v1974_v38 = vpop.f32.mrf.mxu1 }
 0x267   : > { %v1962_v36 = vpop.f32.mrf.mxu0  ;;  %v1606_v39 = vmul.f32 %v1974_v38, %v2671_v52 }
 0x268   : > { %v1598_v29 = vmul.f32 %v1962_v36, %v2671_v52  ;;  %v1575_v47 = vpop.f32.mrf.mxu1 }
 0x269   : > { %v1535_v40 = vpop.f32.mrf.mxu0  ;;  %v1629_v42 = vadd.f32 %v2676_v54, %v1606_v39  ;;  %v1605_v45 = vmul.f32 %v2671_v52, %v1575_v47 }
 0x26a   : > { %v1621_v41 = vadd.f32 %v2676_v54, %v1598_v29  ;;  %v1597_v49 = vmul.f32 %v2671_v52, %v1535_v40 }
 0x26b   : > { %v1645_v51 = vmax.f32 %v1629_v42, 0.0  ;;  %v1628_v50 = vadd.f32 %v2676_v54, %v1605_v45 }
 0x26c   : > { %v1637_v46 = vmax.f32 %v1621_v41, 0.0  ;;  %v1620_v48 = vadd.f32 %v2676_v54, %v1597_v49 }
 0x26d   : > { %1662 = vst.msk [vmem:[%s2206_s18 + $0x78] sm:$0xff] %vm1646_vm12, %v1645_v51  ;;  %v1644_v55 = vmax.f32 %v1628_v50, 0.0 }
 0x26e   : > { %1654 = vst.msk [vmem:[%s2206_s18 + $0x38] sm:$0xff] %vm1646_vm12, %v1637_v46  ;;  %v1636_v53 = vmax.f32 %v1620_v48, 0.0 }
 0x26f   : > { %1661 = vst.msk [vmem:[%s2206_s18 + $0x70] sm:$0xff] %vm1646_vm12, %v1644_v55 }
 0x270   : > { %1653 = vst.msk [vmem:[%s2206_s18 + $0x30] sm:$0xff] %vm1646_vm12, %v1636_v53 }
 0x271 PF: > { %s16_s25 = sadd.s32 1, %s2074_s25   ;;  %s2765_s21 = smov %s2066_s23 }
 0x272   : > { %p13_p12 = scmp.ge.s32.totalorder %s16_s25, 6   ;;  %s2766_s22 = smov %s2070_s24 }
 0x273   : > { %s2767_s23 = smov %s2770_s26  ;;  %s2768_s24 = smov %s2774_s27 }
 0x274   :  { %15 = sbr.rel (!%p13_p12) target bundleno = 3 (0x3), region = 100 }

</bundles_post_ra>
